<compile_context>
chip_gen: v7x
topology: tpu7x:2x2x1
jax: 0.10.0
libtpu: 0.0.40
codegen_flags: <defaults>
</compile_context>

<pallas_src>
import functools

import numpy as np
import jax
import jax.numpy as jnp
from jax.experimental import pallas as pl
from jax.experimental.pallas import tpu as pltpu


# ----------------------------------------------------------------------------
# Fused HourGlassBlock kernel (one chunk of B batch samples per grid step)
# ----------------------------------------------------------------------------
def _hourglass_kernel(x_ref, wd_ref, bd_ref, wc_ref, bc_ref, wu_ref, bu_ref,
                      pool_ref, up_ref, o_ref, *, H, W, B):
    f32 = jnp.float32
    bf16 = jnp.bfloat16
    HW = H * W
    H2, W2 = H // 2, W // 2
    HW2 = H2 * W2
    L, L2 = B * HW, B * HW2
    M = wd_ref.shape[1]

    def lane_shift(v, s, length):
        """out[:, q] = v[:, q + s] on the folded lane axis (cyclic; the caller
        zeroes row / column / sample spill-over with a precomputed mask)."""
        return pltpu.roll(v, (-s) % length, axis=1)

    def make_masks(length, h, w, hw):
        """0/1 f32 validity masks for the shifted 3x3-conv tap groups, built
        ONCE per resolution (not per tap).  Per-sample flat position is
        pos = lane & (hw-1), column is pos & (w-1) (hw, w are powers of two)."""
        pos = jax.lax.broadcasted_iota(jnp.int32, (M, length), 1) & (hw - 1)
        col = pos & (w - 1)
        tof = lambda b: b.astype(f32)
        col_m = tof(col >= 1)          # dw = -1 valid  (w-1 >= 0)
        col_p = tof(col < w - 1)       # dw = +1 valid  (w+1 <= W-1)
        row_m = tof(pos >= w)          # dh = -1 valid  (h-1 >= 0)
        row_p = tof(pos < hw - w)      # dh = +1 valid  (h+1 <= H-1)
        return col_m, col_p, row_m, row_p

    def residual(v, r, w, length, masks):
        """Residual block r (use_bn=False, in_ch == out_ch) on a (C, length) tile."""
        col_m, col_p, row_m, row_p = masks
        # 1x1 down_channel conv + ReLU (bf16 operands, f32 accumulate / bias).
        d = jnp.dot(wd_ref[r], v.astype(bf16), preferred_element_type=f32) + bd_ref[r]
        d = jnp.maximum(d, 0.0)                                      # (M, length)
        # 3x3 conv (padding=1), row-group decomposition: column-shifted copies
        # (kw = 0,1,2 <-> dw = -1,0,+1) stacked on the sublane axis, one K=3M
        # dot per kernel row kh, then the kh=0 / kh=2 partials are row-shifted
        # by -/+w, masked and accumulated.
        t_m = lane_shift(d, -1, length) * col_m
        t_p = lane_shift(d, +1, length) * col_p
        t = jnp.concatenate([t_m, d, t_p], axis=0).astype(bf16)      # (3M, length)
        x0 = jnp.dot(wc_ref[r, 0], t, preferred_element_type=f32)    # kh=0 (dh=-1)
        x1 = jnp.dot(wc_ref[r, 1], t, preferred_element_type=f32)    # kh=1 (dh= 0)
        x2 = jnp.dot(wc_ref[r, 2], t, preferred_element_type=f32)    # kh=2 (dh=+1)
        c = x1 + lane_shift(x0, -w, length) * row_m \
               + lane_shift(x2, +w, length) * row_p
        c = jnp.maximum(c + bc_ref[r], 0.0)                          # (M, length)
        # 1x1 up_channel conv, identity skip, final ReLU.
        y = jnp.dot(wu_ref[r], c.astype(bf16), preferred_element_type=f32) + bu_ref[r]
        return jnp.maximum(y + v, 0.0)                               # (C, length)

    x = x_ref[0].astype(f32)                                         # (C, B*HW)

    # --- down_sampling: MaxPool2d(2,2) then residual 0 -------------------------
    # Two shifted pairwise maxes leave the 2x2-window maximum at every even
    # (h, w) position; the block-diagonal 0/1 selection matmul compacts those
    # to (C, B*HW/4).  Shift wrap / spill-over positions are never selected,
    # so no masks are needed here.
    mh = jnp.maximum(x, lane_shift(x, 1, L))
    mv = jnp.maximum(mh, lane_shift(mh, W, L))
    ds = jnp.dot(mv.astype(bf16), pool_ref[...], preferred_element_type=f32)

    masks_lo = make_masks(L2, H2, W2, HW2)
    ds = residual(ds, 0, W2, L2, masks_lo)

    # --- trans branch: residual 1 ----------------------------------------------
    tr = residual(ds, 1, W2, L2, masks_lo)

    # --- sub hourglass (block_count=0): residuals 2..4 --------------------------
    sub = ds
    for r in (2, 3, 4):
        sub = residual(sub, r, W2, L2, masks_lo)

    # --- up_sampling: bilinear 2x (align_corners=False) then residual 5 ---------
    y = jnp.dot((tr + sub).astype(bf16), up_ref[...], preferred_element_type=f32)
    masks_hi = make_masks(L, H, W, HW)
    y = residual(y, 5, W, L, masks_hi)

    o_ref[0] = y.astype(o_ref.dtype)


def _replicated_spec(arr):
    nd = arr.ndim
    return pl.BlockSpec(arr.shape, lambda n, _nd=nd: (0,) * _nd)


def hourglass_forward(x_nchw, kernel_weights, pool1, up1, samples_per_step=2):
    """HourGlassBlock forward.

    x_nchw:          (N, C, H, W) float32 (PyTorch layout).
    kernel_weights:  (WD, BD, WC, BC, WU, BU) -- matmul weights in bf16, biases
                     f32, stacked over the 6 Residual blocks (see init_weights).
    pool1 / up1:     per-sample (HW, HW/4) maxpool-selection and (HW/4, HW)
                     bilinear-upsample matrices (float32 numpy).
    """
    N, C, H, W = x_nchw.shape
    assert H % 2 == 0 and W % 2 == 0, "MaxPool2d(2,2) / bilinear 2x need even H, W"
    assert (H & (H - 1)) == 0 and (W & (W - 1)) == 0, \
        "power-of-two spatial dims required by the flat-index mask arithmetic"
    B = samples_per_step
    assert N % B == 0, (N, B)
    chunks = N // B
    HW = H * W
    L = B * HW

    # Fold B samples onto the lane axis: (chunks, C, B*HW), lane = b*HW + h*W + w.
    xf = (x_nchw.reshape(chunks, B, C, HW)
                .transpose(0, 2, 1, 3)
                .reshape(chunks, C, L))

    # Block-diagonal (per-chunk) pool / upsample matrices as bf16 MXU operands.
    # TODO(synk): kron(I_B, .) scales as B^2; for very large folds build these
    # as per-sample lane-sliced dots instead.
    eye = np.eye(B, dtype=np.float32)
    pool_sel = jnp.asarray(np.kron(eye, pool1), jnp.bfloat16)     # (B*HW, B*HW/4)
    up_mat = jnp.asarray(np.kron(eye, up1), jnp.bfloat16)         # (B*HW/4, B*HW)

    WD, BD, WC, BC, WU, BU = kernel_weights
    out = pl.pallas_call(
        functools.partial(_hourglass_kernel, H=H, W=W, B=B),
        out_shape=jax.ShapeDtypeStruct((chunks, C, L), jnp.float32),
        grid=(chunks,),
        in_specs=[
            pl.BlockSpec((1, C, L), lambda n: (n, 0, 0)),
            _replicated_spec(WD), _replicated_spec(BD), _replicated_spec(WC),
            _replicated_spec(BC), _replicated_spec(WU), _replicated_spec(BU),
            _replicated_spec(pool_sel), _replicated_spec(up_mat),
        ],
        out_specs=pl.BlockSpec((1, C, L), lambda n: (n, 0, 0)),
        compiler_params=pltpu.CompilerParams(
            # Chunks are independent -> v7x's two TensorCores split them.
            dimension_semantics=("parallel",),
        ),
    )(xf, WD, BD, WC, BC, WU, BU, pool_sel, up_mat)

    return (out.reshape(chunks, C, B, HW)
               .transpose(0, 2, 1, 3)
               .reshape(N, C, H, W))


# ----------------------------------------------------------------------------
# Host-side constant matrices (built once, DMA'd with the weights)
# ----------------------------------------------------------------------------
def _bilinear_matrix(size_in):
    """(2*size_in, size_in) 1-D interpolation matrix matching
    nn.Upsample(scale_factor=2, mode='bilinear', align_corners=False)."""
    out = 2 * size_in
    src = (np.arange(out, dtype=np.float64) + 0.5) / 2.0 - 0.5
    x0 = np.floor(src)
    lam = src - x0
    i0 = np.clip(x0, 0, size_in - 1).astype(np.int64)
    i1 = np.clip(x0 + 1, 0, size_in - 1).astype(np.int64)
    A = np.zeros((out, size_in), np.float64)
    A[np.arange(out), i0] += 1.0 - lam
    A[np.arange(out), i1] += lam
    return A.astype(np.float32)


def _maxpool_select_matrix(H, W):
    """(H*W, (H//2)*(W//2)) 0/1 lane-compaction matrix for MaxPool2d(2,2):
    column a*(W//2)+b selects flat position (2a)*W + 2b, where the two shifted
    pairwise maxes have left the 2x2-window maximum."""
    H2, W2 = H // 2, W // 2
    S = np.zeros((H * W, H2 * W2), np.float32)
    for a in range(H2):
        for b in range(W2):
            S[(2 * a) * W + 2 * b, a * W2 + b] = 1.0
    return S


# ----------------------------------------------------------------------------
# Synthetic parameters (deterministic) for the 6 Residual blocks
# ----------------------------------------------------------------------------
def init_weights(key, C, M, n_res=6):
    """f32 master weights; Residual order:
    0 = down_sampling, 1 = trans, 2..4 = sub hourglass (block_count=0), 5 = up.

    Layouts (matmul-ready, spatial-on-lanes):
      WD: (6, M, C)        1x1 down_channel     (PyTorch (M, C, 1, 1))
      WC: (6, 3, M, 3*M)   3x3 conv grouped by kernel row:
                           WC[r, kh, m_out, kw*M + m_in]
                           == PyTorch conv.weight[m_out, m_in, kh, kw]
      WU: (6, C, M)        1x1 up_channel       (PyTorch (C, M, 1, 1))
      biases as (6, ch, 1) columns (broadcast over the lane axis).
    """
    ks = jax.random.split(key, 6)
    WD = 0.3 * jax.random.normal(ks[0], (n_res, M, C), jnp.float32)
    BD = 0.1 * jax.random.normal(ks[1], (n_res, M, 1), jnp.float32)
    WC = 0.2 * jax.random.normal(ks[2], (n_res, 3, M, 3 * M), jnp.float32)
    BC = 0.1 * jax.random.normal(ks[3], (n_res, M, 1), jnp.float32)
    WU = 0.3 * jax.random.normal(ks[4], (n_res, C, M), jnp.float32)
    BU = 0.1 * jax.random.normal(ks[5], (n_res, C, 1), jnp.float32)
    return WD, BD, WC, BC, WU, BU


def split_weights(weights):
    """bf16 matmul weights for the kernel and the exact same (bf16-rounded)
    values in f32 for the strict reference, so validation only sees activation /
    accumulation rounding, not weight-quantization noise."""
    WD, BD, WC, BC, WU, BU = weights
    WDq, WCq, WUq = (w.astype(jnp.bfloat16) for w in (WD, WC, WU))
    kernel_w = (WDq, BD, WCq, BC, WUq, BU)
    ref_w = (WDq.astype(jnp.float32), BD, WCq.astype(jnp.float32), BC,
             WUq.astype(jnp.float32), BU)
    return kernel_w, ref_w


# ----------------------------------------------------------------------------
# Plain-JAX f32 reference (validation only)
# ----------------------------------------------------------------------------
def _residual_ref(x, r, WD, BD, WC, BC, WU, BU):
    hi = jax.lax.Precision.HIGHEST
    M = WD.shape[1]
    H, W = x.shape[2], x.shape[3]
    d = jnp.maximum(jnp.einsum('mc,nchw->nmhw', WD[r], x, precision=hi)
                    + BD[r][:, :, None], 0.0)
    dp = jnp.pad(d, ((0, 0), (0, 0), (1, 1), (1, 1)))
    acc = 0.0
    for kh in range(3):
        for kw in range(3):
            wt = WC[r, kh][:, kw * M:(kw + 1) * M]
            acc = acc + jnp.einsum('om,nmhw->nohw', wt,
                                   dp[:, :, kh:kh + H, kw:kw + W], precision=hi)
    c = jnp.maximum(acc + BC[r][:, :, None], 0.0)
    u = jnp.einsum('cm,nmhw->nchw', WU[r], c, precision=hi) + BU[r][:, :, None]
    return jnp.maximum(u + x, 0.0)


def hourglass_block_ref(x, weights, A_h, A_w):
    N, C, H, W = x.shape
    ds = x.reshape(N, C, H // 2, 2, W // 2, 2).max(axis=(3, 5))
    ds = _residual_ref(ds, 0, *weights)
    tr = _residual_ref(ds, 1, *weights)
    sub = ds
    for r in (2, 3, 4):
        sub = _residual_ref(sub, r, *weights)
    y = jnp.einsum('Hh,Ww,nchw->ncHW', A_h, A_w, tr + sub,
                   precision=jax.lax.Precision.HIGHEST)
    return _residual_ref(y, 5, *weights)


# ----------------------------------------------------------------------------
if __name__ == "__main__":
    # HourGlassBlock config: block_count=1, residual_each_block=1,
    # input_channels=4, mid_channels=8, use_bn=False -> 6 Residual blocks.
    C, M = 4, 8
    N, H, W = 4, 16, 16          # 4 samples -> 2 chunks, each folding B=2 samples
    B = 2                        # samples folded onto the lane axis per grid step

    key = jax.random.PRNGKey(0)
    k_inp, k_par = jax.random.split(key)
    x = jax.random.normal(k_inp, (N, C, H, W), jnp.float32)   # NCHW like PyTorch
    kernel_w, ref_w = split_weights(init_weights(k_par, C, M))

    A_h = _bilinear_matrix(H // 2)                             # (H, H//2)
    A_w = _bilinear_matrix(W // 2)                             # (W, W//2)
    up1 = np.kron(A_h, A_w).T                                  # (HW/4, HW)
    pool1 = _maxpool_select_matrix(H, W)                       # (HW, HW/4)

    out = jax.block_until_ready(
        hourglass_forward(x, kernel_w, pool1, up1, samples_per_step=B))
    assert out.shape == x.shape, (out.shape, x.shape)
    assert bool(jnp.all(jnp.isfinite(out)))

    # Validate against the strict f32 JAX reference (kernel matmul operands are
    # bf16 with f32 accumulation, so allow a few percent).
    ref = hourglass_block_ref(x, ref_w, jnp.asarray(A_h), jnp.asarray(A_w))
    err = float(jnp.max(jnp.abs(out - ref)))
    tol = 5e-2 * (float(jnp.max(jnp.abs(ref))) + 1.0)
    assert err <= tol, (err, tol)

    print("KERNEL_OK")
</pallas_src>

<mosaic_0001>
module attributes {stable_mosaic.version = 11 : i64} {
  func.func @_hourglass_kernel(%arg0: i32, %arg1: memref<1x4x512xf32, #tpu.memory_space<vmem>>, %arg2: memref<6x8x4xbf16, #tpu.memory_space<vmem>>, %arg3: memref<6x8x1xf32, #tpu.memory_space<vmem>>, %arg4: memref<6x3x8x24xbf16, #tpu.memory_space<vmem>>, %arg5: memref<6x8x1xf32, #tpu.memory_space<vmem>>, %arg6: memref<6x4x8xbf16, #tpu.memory_space<vmem>>, %arg7: memref<6x4x1xf32, #tpu.memory_space<vmem>>, %arg8: memref<512x128xbf16, #tpu.memory_space<vmem>>, %arg9: memref<128x512xbf16, #tpu.memory_space<vmem>>, %arg10: memref<1x4x512xf32, #tpu.memory_space<vmem>>) attributes {dimension_semantics = [#tpu.dimension_semantics<parallel>], iteration_bounds = array<i64: 2>, scalar_prefetch = 0 : i64, scratch_operands = 0 : i64, tpu.core_type = #tpu.core_type<tc>, window_params = [{transform_indices = @transform_0, window_bounds = array<i64: 1, 4, 512>}, {pipeline_mode = #tpu.pipeline_mode<synchronous>, transform_indices = @transform_1, window_bounds = array<i64: 6, 8, 4>}, {pipeline_mode = #tpu.pipeline_mode<synchronous>, transform_indices = @transform_2, window_bounds = array<i64: 6, 8, 1>}, {pipeline_mode = #tpu.pipeline_mode<synchronous>, transform_indices = @transform_3, window_bounds = array<i64: 6, 3, 8, 24>}, {pipeline_mode = #tpu.pipeline_mode<synchronous>, transform_indices = @transform_4, window_bounds = array<i64: 6, 8, 1>}, {pipeline_mode = #tpu.pipeline_mode<synchronous>, transform_indices = @transform_5, window_bounds = array<i64: 6, 4, 8>}, {pipeline_mode = #tpu.pipeline_mode<synchronous>, transform_indices = @transform_6, window_bounds = array<i64: 6, 4, 1>}, {pipeline_mode = #tpu.pipeline_mode<synchronous>, transform_indices = @transform_7, window_bounds = array<i64: 512, 128>}, {pipeline_mode = #tpu.pipeline_mode<synchronous>, transform_indices = @transform_8, window_bounds = array<i64: 128, 512>}, {transform_indices = @transform_9, window_bounds = array<i64: 1, 4, 512>}]} {
    %c0 = arith.constant 0 : index
    %c0_0 = arith.constant 0 : index
    %c0_1 = arith.constant 0 : index
    %0 = vector.load %arg1[%c0, %c0_0, %c0_1] : memref<1x4x512xf32, #tpu.memory_space<vmem>>, vector<1x4x512xf32>
    %1 = vector.shape_cast %0 : vector<1x4x512xf32> to vector<4x512xf32>
    %c511_i32 = arith.constant 511 : i32
    %2 = tpu.dynamic_rotate %1 by %c511_i32 dim 1 : vector<4x512xf32>, i32 -> vector<4x512xf32>
    %3 = arith.maximumf %1, %2 : vector<4x512xf32>
    %c496_i32 = arith.constant 496 : i32
    %4 = tpu.dynamic_rotate %3 by %c496_i32 dim 1 : vector<4x512xf32>, i32 -> vector<4x512xf32>
    %5 = arith.maximumf %3, %4 : vector<4x512xf32>
    %6 = arith.truncf %5 : vector<4x512xf32> to vector<4x512xbf16>
    %c0_2 = arith.constant 0 : index
    %c0_3 = arith.constant 0 : index
    %7 = vector.load %arg8[%c0_2, %c0_3] : memref<512x128xbf16, #tpu.memory_space<vmem>>, vector<512x128xbf16>
    %cst = arith.constant dense<0.000000e+00> : vector<4x128xf32>
    %8 = tpu.matmul %6, %7, %cst {dimension_numbers = #tpu.dot_dimension_numbers<[1], [0], [0], [1], [0, 0, 1, 1], [], []>} : vector<4x512xbf16>, vector<512x128xbf16>, vector<4x128xf32> -> vector<4x128xf32>
    %9 = tpu.iota {dimensions = array<i32: 1>} : vector<8x128xi32>
    %c63_i32 = arith.constant 63 : i32
    %10 = vector.broadcast %c63_i32 : i32 to vector<8x128xi32>
    %11 = arith.andi %9, %10 : vector<8x128xi32>
    %c7_i32 = arith.constant 7 : i32
    %12 = vector.broadcast %c7_i32 : i32 to vector<8x128xi32>
    %13 = arith.andi %11, %12 : vector<8x128xi32>
    %c1_i32 = arith.constant 1 : i32
    %14 = vector.broadcast %c1_i32 : i32 to vector<8x128xi32>
    %15 = arith.cmpi sge, %13, %14 : vector<8x128xi32>
    %16 = arith.extui %15 : vector<8x128xi1> to vector<8x128xi32>
    %17 = arith.sitofp %16 : vector<8x128xi32> to vector<8x128xf32>
    %c7_i32_4 = arith.constant 7 : i32
    %18 = vector.broadcast %c7_i32_4 : i32 to vector<8x128xi32>
    %19 = arith.cmpi slt, %13, %18 : vector<8x128xi32>
    %20 = arith.extui %19 : vector<8x128xi1> to vector<8x128xi32>
    %21 = arith.sitofp %20 : vector<8x128xi32> to vector<8x128xf32>
    %c8_i32 = arith.constant 8 : i32
    %22 = vector.broadcast %c8_i32 : i32 to vector<8x128xi32>
    %23 = arith.cmpi sge, %11, %22 : vector<8x128xi32>
    %24 = arith.extui %23 : vector<8x128xi1> to vector<8x128xi32>
    %25 = arith.sitofp %24 : vector<8x128xi32> to vector<8x128xf32>
    %c56_i32 = arith.constant 56 : i32
    %26 = vector.broadcast %c56_i32 : i32 to vector<8x128xi32>
    %27 = arith.cmpi slt, %11, %26 : vector<8x128xi32>
    %28 = arith.extui %27 : vector<8x128xi1> to vector<8x128xi32>
    %29 = arith.sitofp %28 : vector<8x128xi32> to vector<8x128xf32>
    %c0_5 = arith.constant 0 : index
    %c0_6 = arith.constant 0 : index
    %c0_7 = arith.constant 0 : index
    %30 = vector.load %arg2[%c0_5, %c0_6, %c0_7] : memref<6x8x4xbf16, #tpu.memory_space<vmem>>, vector<1x8x4xbf16>
    %31 = vector.shape_cast %30 : vector<1x8x4xbf16> to vector<8x4xbf16>
    %32 = arith.truncf %8 : vector<4x128xf32> to vector<4x128xbf16>
    %cst_8 = arith.constant dense<0.000000e+00> : vector<8x128xf32>
    %33 = tpu.matmul %31, %32, %cst_8 {dimension_numbers = #tpu.dot_dimension_numbers<[1], [0], [0], [1], [0, 0, 1, 1], [], []>} : vector<8x4xbf16>, vector<4x128xbf16>, vector<8x128xf32> -> vector<8x128xf32>
    %c0_9 = arith.constant 0 : index
    %c0_10 = arith.constant 0 : index
    %c0_11 = arith.constant 0 : index
    %34 = vector.load %arg3[%c0_9, %c0_10, %c0_11] : memref<6x8x1xf32, #tpu.memory_space<vmem>>, vector<1x8x1xf32>
    %35 = vector.shape_cast %34 : vector<1x8x1xf32> to vector<8x1xf32>
    %36 = vector.broadcast %35 : vector<8x1xf32> to vector<8x128xf32>
    %37 = arith.addf %33, %36 : vector<8x128xf32>
    %cst_12 = arith.constant 0.000000e+00 : f32
    %38 = vector.broadcast %cst_12 : f32 to vector<8x128xf32>
    %39 = arith.maximumf %37, %38 : vector<8x128xf32>
    %c1_i32_13 = arith.constant 1 : i32
    %40 = tpu.dynamic_rotate %39 by %c1_i32_13 dim 1 : vector<8x128xf32>, i32 -> vector<8x128xf32>
    %41 = arith.mulf %40, %17 : vector<8x128xf32>
    %c127_i32 = arith.constant 127 : i32
    %42 = tpu.dynamic_rotate %39 by %c127_i32 dim 1 : vector<8x128xf32>, i32 -> vector<8x128xf32>
    %43 = arith.mulf %42, %21 : vector<8x128xf32>
    %44 = tpu.concatenate %41, %39, %43 in 0 : vector<8x128xf32>, vector<8x128xf32>, vector<8x128xf32> -> vector<24x128xf32>
    %45 = arith.truncf %44 : vector<24x128xf32> to vector<24x128xbf16>
    %c0_14 = arith.constant 0 : index
    %c0_15 = arith.constant 0 : index
    %c0_16 = arith.constant 0 : index
    %c0_17 = arith.constant 0 : index
    %46 = vector.load %arg4[%c0_14, %c0_15, %c0_16, %c0_17] : memref<6x3x8x24xbf16, #tpu.memory_space<vmem>>, vector<1x1x8x24xbf16>
    %47 = vector.shape_cast %46 : vector<1x1x8x24xbf16> to vector<8x24xbf16>
    %cst_18 = arith.constant dense<0.000000e+00> : vector<8x128xf32>
    %48 = tpu.matmul %47, %45, %cst_18 {dimension_numbers = #tpu.dot_dimension_numbers<[1], [0], [0], [1], [0, 0, 1, 1], [], []>} : vector<8x24xbf16>, vector<24x128xbf16>, vector<8x128xf32> -> vector<8x128xf32>
    %c0_19 = arith.constant 0 : index
    %c1 = arith.constant 1 : index
    %c0_20 = arith.constant 0 : index
    %c0_21 = arith.constant 0 : index
    %49 = vector.load %arg4[%c0_19, %c1, %c0_20, %c0_21] : memref<6x3x8x24xbf16, #tpu.memory_space<vmem>>, vector<1x1x8x24xbf16>
    %50 = vector.shape_cast %49 : vector<1x1x8x24xbf16> to vector<8x24xbf16>
    %cst_22 = arith.constant dense<0.000000e+00> : vector<8x128xf32>
    %51 = tpu.matmul %50, %45, %cst_22 {dimension_numbers = #tpu.dot_dimension_numbers<[1], [0], [0], [1], [0, 0, 1, 1], [], []>} : vector<8x24xbf16>, vector<24x128xbf16>, vector<8x128xf32> -> vector<8x128xf32>
    %c0_23 = arith.constant 0 : index
    %c2 = arith.constant 2 : index
    %c0_24 = arith.constant 0 : index
    %c0_25 = arith.constant 0 : index
    %52 = vector.load %arg4[%c0_23, %c2, %c0_24, %c0_25] : memref<6x3x8x24xbf16, #tpu.memory_space<vmem>>, vector<1x1x8x24xbf16>
    %53 = vector.shape_cast %52 : vector<1x1x8x24xbf16> to vector<8x24xbf16>
    %cst_26 = arith.constant dense<0.000000e+00> : vector<8x128xf32>
    %54 = tpu.matmul %53, %45, %cst_26 {dimension_numbers = #tpu.dot_dimension_numbers<[1], [0], [0], [1], [0, 0, 1, 1], [], []>} : vector<8x24xbf16>, vector<24x128xbf16>, vector<8x128xf32> -> vector<8x128xf32>
    %c8_i32_27 = arith.constant 8 : i32
    %55 = tpu.dynamic_rotate %48 by %c8_i32_27 dim 1 : vector<8x128xf32>, i32 -> vector<8x128xf32>
    %56 = arith.mulf %55, %25 : vector<8x128xf32>
    %57 = arith.addf %51, %56 : vector<8x128xf32>
    %c120_i32 = arith.constant 120 : i32
    %58 = tpu.dynamic_rotate %54 by %c120_i32 dim 1 : vector<8x128xf32>, i32 -> vector<8x128xf32>
    %59 = arith.mulf %58, %29 : vector<8x128xf32>
    %60 = arith.addf %57, %59 : vector<8x128xf32>
    %c0_28 = arith.constant 0 : index
    %c0_29 = arith.constant 0 : index
    %c0_30 = arith.constant 0 : index
    %61 = vector.load %arg5[%c0_28, %c0_29, %c0_30] : memref<6x8x1xf32, #tpu.memory_space<vmem>>, vector<1x8x1xf32>
    %62 = vector.shape_cast %61 : vector<1x8x1xf32> to vector<8x1xf32>
    %63 = vector.broadcast %62 : vector<8x1xf32> to vector<8x128xf32>
    %64 = arith.addf %60, %63 : vector<8x128xf32>
    %cst_31 = arith.constant 0.000000e+00 : f32
    %65 = vector.broadcast %cst_31 : f32 to vector<8x128xf32>
    %66 = arith.maximumf %64, %65 : vector<8x128xf32>
    %c0_32 = arith.constant 0 : index
    %c0_33 = arith.constant 0 : index
    %c0_34 = arith.constant 0 : index
    %67 = vector.load %arg6[%c0_32, %c0_33, %c0_34] : memref<6x4x8xbf16, #tpu.memory_space<vmem>>, vector<1x4x8xbf16>
    %68 = vector.shape_cast %67 : vector<1x4x8xbf16> to vector<4x8xbf16>
    %69 = arith.truncf %66 : vector<8x128xf32> to vector<8x128xbf16>
    %cst_35 = arith.constant dense<0.000000e+00> : vector<4x128xf32>
    %70 = tpu.matmul %68, %69, %cst_35 {dimension_numbers = #tpu.dot_dimension_numbers<[1], [0], [0], [1], [0, 0, 1, 1], [], []>} : vector<4x8xbf16>, vector<8x128xbf16>, vector<4x128xf32> -> vector<4x128xf32>
    %c0_36 = arith.constant 0 : index
    %c0_37 = arith.constant 0 : index
    %c0_38 = arith.constant 0 : index
    %71 = vector.load %arg7[%c0_36, %c0_37, %c0_38] : memref<6x4x1xf32, #tpu.memory_space<vmem>>, vector<1x4x1xf32>
    %72 = vector.shape_cast %71 : vector<1x4x1xf32> to vector<4x1xf32>
    %73 = vector.broadcast %72 : vector<4x1xf32> to vector<4x128xf32>
    %74 = arith.addf %70, %73 : vector<4x128xf32>
    %75 = arith.addf %74, %8 : vector<4x128xf32>
    %cst_39 = arith.constant 0.000000e+00 : f32
    %76 = vector.broadcast %cst_39 : f32 to vector<4x128xf32>
    %77 = arith.maximumf %75, %76 : vector<4x128xf32>
    %c1_40 = arith.constant 1 : index
    %c0_41 = arith.constant 0 : index
    %c0_42 = arith.constant 0 : index
    %78 = vector.load %arg2[%c1_40, %c0_41, %c0_42] : memref<6x8x4xbf16, #tpu.memory_space<vmem>>, vector<1x8x4xbf16>
    %79 = vector.shape_cast %78 : vector<1x8x4xbf16> to vector<8x4xbf16>
    %80 = arith.truncf %77 : vector<4x128xf32> to vector<4x128xbf16>
    %cst_43 = arith.constant dense<0.000000e+00> : vector<8x128xf32>
    %81 = tpu.matmul %79, %80, %cst_43 {dimension_numbers = #tpu.dot_dimension_numbers<[1], [0], [0], [1], [0, 0, 1, 1], [], []>} : vector<8x4xbf16>, vector<4x128xbf16>, vector<8x128xf32> -> vector<8x128xf32>
    %c1_44 = arith.constant 1 : index
    %c0_45 = arith.constant 0 : index
    %c0_46 = arith.constant 0 : index
    %82 = vector.load %arg3[%c1_44, %c0_45, %c0_46] : memref<6x8x1xf32, #tpu.memory_space<vmem>>, vector<1x8x1xf32>
    %83 = vector.shape_cast %82 : vector<1x8x1xf32> to vector<8x1xf32>
    %84 = vector.broadcast %83 : vector<8x1xf32> to vector<8x128xf32>
    %85 = arith.addf %81, %84 : vector<8x128xf32>
    %cst_47 = arith.constant 0.000000e+00 : f32
    %86 = vector.broadcast %cst_47 : f32 to vector<8x128xf32>
    %87 = arith.maximumf %85, %86 : vector<8x128xf32>
    %c1_i32_48 = arith.constant 1 : i32
    %88 = tpu.dynamic_rotate %87 by %c1_i32_48 dim 1 : vector<8x128xf32>, i32 -> vector<8x128xf32>
    %89 = arith.mulf %88, %17 : vector<8x128xf32>
    %c127_i32_49 = arith.constant 127 : i32
    %90 = tpu.dynamic_rotate %87 by %c127_i32_49 dim 1 : vector<8x128xf32>, i32 -> vector<8x128xf32>
    %91 = arith.mulf %90, %21 : vector<8x128xf32>
    %92 = tpu.concatenate %89, %87, %91 in 0 : vector<8x128xf32>, vector<8x128xf32>, vector<8x128xf32> -> vector<24x128xf32>
    %93 = arith.truncf %92 : vector<24x128xf32> to vector<24x128xbf16>
    %c1_50 = arith.constant 1 : index
    %c0_51 = arith.constant 0 : index
    %c0_52 = arith.constant 0 : index
    %c0_53 = arith.constant 0 : index
    %94 = vector.load %arg4[%c1_50, %c0_51, %c0_52, %c0_53] : memref<6x3x8x24xbf16, #tpu.memory_space<vmem>>, vector<1x1x8x24xbf16>
    %95 = vector.shape_cast %94 : vector<1x1x8x24xbf16> to vector<8x24xbf16>
    %cst_54 = arith.constant dense<0.000000e+00> : vector<8x128xf32>
    %96 = tpu.matmul %95, %93, %cst_54 {dimension_numbers = #tpu.dot_dimension_numbers<[1], [0], [0], [1], [0, 0, 1, 1], [], []>} : vector<8x24xbf16>, vector<24x128xbf16>, vector<8x128xf32> -> vector<8x128xf32>
    %c1_55 = arith.constant 1 : index
    %c1_56 = arith.constant 1 : index
    %c0_57 = arith.constant 0 : index
    %c0_58 = arith.constant 0 : index
    %97 = vector.load %arg4[%c1_55, %c1_56, %c0_57, %c0_58] : memref<6x3x8x24xbf16, #tpu.memory_space<vmem>>, vector<1x1x8x24xbf16>
    %98 = vector.shape_cast %97 : vector<1x1x8x24xbf16> to vector<8x24xbf16>
    %cst_59 = arith.constant dense<0.000000e+00> : vector<8x128xf32>
    %99 = tpu.matmul %98, %93, %cst_59 {dimension_numbers = #tpu.dot_dimension_numbers<[1], [0], [0], [1], [0, 0, 1, 1], [], []>} : vector<8x24xbf16>, vector<24x128xbf16>, vector<8x128xf32> -> vector<8x128xf32>
    %c1_60 = arith.constant 1 : index
    %c2_61 = arith.constant 2 : index
    %c0_62 = arith.constant 0 : index
    %c0_63 = arith.constant 0 : index
    %100 = vector.load %arg4[%c1_60, %c2_61, %c0_62, %c0_63] : memref<6x3x8x24xbf16, #tpu.memory_space<vmem>>, vector<1x1x8x24xbf16>
    %101 = vector.shape_cast %100 : vector<1x1x8x24xbf16> to vector<8x24xbf16>
    %cst_64 = arith.constant dense<0.000000e+00> : vector<8x128xf32>
    %102 = tpu.matmul %101, %93, %cst_64 {dimension_numbers = #tpu.dot_dimension_numbers<[1], [0], [0], [1], [0, 0, 1, 1], [], []>} : vector<8x24xbf16>, vector<24x128xbf16>, vector<8x128xf32> -> vector<8x128xf32>
    %c8_i32_65 = arith.constant 8 : i32
    %103 = tpu.dynamic_rotate %96 by %c8_i32_65 dim 1 : vector<8x128xf32>, i32 -> vector<8x128xf32>
    %104 = arith.mulf %103, %25 : vector<8x128xf32>
    %105 = arith.addf %99, %104 : vector<8x128xf32>
    %c120_i32_66 = arith.constant 120 : i32
    %106 = tpu.dynamic_rotate %102 by %c120_i32_66 dim 1 : vector<8x128xf32>, i32 -> vector<8x128xf32>
    %107 = arith.mulf %106, %29 : vector<8x128xf32>
    %108 = arith.addf %105, %107 : vector<8x128xf32>
    %c1_67 = arith.constant 1 : index
    %c0_68 = arith.constant 0 : index
    %c0_69 = arith.constant 0 : index
    %109 = vector.load %arg5[%c1_67, %c0_68, %c0_69] : memref<6x8x1xf32, #tpu.memory_space<vmem>>, vector<1x8x1xf32>
    %110 = vector.shape_cast %109 : vector<1x8x1xf32> to vector<8x1xf32>
    %111 = vector.broadcast %110 : vector<8x1xf32> to vector<8x128xf32>
    %112 = arith.addf %108, %111 : vector<8x128xf32>
    %cst_70 = arith.constant 0.000000e+00 : f32
    %113 = vector.broadcast %cst_70 : f32 to vector<8x128xf32>
    %114 = arith.maximumf %112, %113 : vector<8x128xf32>
    %c1_71 = arith.constant 1 : index
    %c0_72 = arith.constant 0 : index
    %c0_73 = arith.constant 0 : index
    %115 = vector.load %arg6[%c1_71, %c0_72, %c0_73] : memref<6x4x8xbf16, #tpu.memory_space<vmem>>, vector<1x4x8xbf16>
    %116 = vector.shape_cast %115 : vector<1x4x8xbf16> to vector<4x8xbf16>
    %117 = arith.truncf %114 : vector<8x128xf32> to vector<8x128xbf16>
    %cst_74 = arith.constant dense<0.000000e+00> : vector<4x128xf32>
    %118 = tpu.matmul %116, %117, %cst_74 {dimension_numbers = #tpu.dot_dimension_numbers<[1], [0], [0], [1], [0, 0, 1, 1], [], []>} : vector<4x8xbf16>, vector<8x128xbf16>, vector<4x128xf32> -> vector<4x128xf32>
    %c1_75 = arith.constant 1 : index
    %c0_76 = arith.constant 0 : index
    %c0_77 = arith.constant 0 : index
    %119 = vector.load %arg7[%c1_75, %c0_76, %c0_77] : memref<6x4x1xf32, #tpu.memory_space<vmem>>, vector<1x4x1xf32>
    %120 = vector.shape_cast %119 : vector<1x4x1xf32> to vector<4x1xf32>
    %121 = vector.broadcast %120 : vector<4x1xf32> to vector<4x128xf32>
    %122 = arith.addf %118, %121 : vector<4x128xf32>
    %123 = arith.addf %122, %77 : vector<4x128xf32>
    %cst_78 = arith.constant 0.000000e+00 : f32
    %124 = vector.broadcast %cst_78 : f32 to vector<4x128xf32>
    %125 = arith.maximumf %123, %124 : vector<4x128xf32>
    %c2_79 = arith.constant 2 : index
    %c0_80 = arith.constant 0 : index
    %c0_81 = arith.constant 0 : index
    %126 = vector.load %arg2[%c2_79, %c0_80, %c0_81] : memref<6x8x4xbf16, #tpu.memory_space<vmem>>, vector<1x8x4xbf16>
    %127 = vector.shape_cast %126 : vector<1x8x4xbf16> to vector<8x4xbf16>
    %128 = arith.truncf %77 : vector<4x128xf32> to vector<4x128xbf16>
    %cst_82 = arith.constant dense<0.000000e+00> : vector<8x128xf32>
    %129 = tpu.matmul %127, %128, %cst_82 {dimension_numbers = #tpu.dot_dimension_numbers<[1], [0], [0], [1], [0, 0, 1, 1], [], []>} : vector<8x4xbf16>, vector<4x128xbf16>, vector<8x128xf32> -> vector<8x128xf32>
    %c2_83 = arith.constant 2 : index
    %c0_84 = arith.constant 0 : index
    %c0_85 = arith.constant 0 : index
    %130 = vector.load %arg3[%c2_83, %c0_84, %c0_85] : memref<6x8x1xf32, #tpu.memory_space<vmem>>, vector<1x8x1xf32>
    %131 = vector.shape_cast %130 : vector<1x8x1xf32> to vector<8x1xf32>
    %132 = vector.broadcast %131 : vector<8x1xf32> to vector<8x128xf32>
    %133 = arith.addf %129, %132 : vector<8x128xf32>
    %cst_86 = arith.constant 0.000000e+00 : f32
    %134 = vector.broadcast %cst_86 : f32 to vector<8x128xf32>
    %135 = arith.maximumf %133, %134 : vector<8x128xf32>
    %c1_i32_87 = arith.constant 1 : i32
    %136 = tpu.dynamic_rotate %135 by %c1_i32_87 dim 1 : vector<8x128xf32>, i32 -> vector<8x128xf32>
    %137 = arith.mulf %136, %17 : vector<8x128xf32>
    %c127_i32_88 = arith.constant 127 : i32
    %138 = tpu.dynamic_rotate %135 by %c127_i32_88 dim 1 : vector<8x128xf32>, i32 -> vector<8x128xf32>
    %139 = arith.mulf %138, %21 : vector<8x128xf32>
    %140 = tpu.concatenate %137, %135, %139 in 0 : vector<8x128xf32>, vector<8x128xf32>, vector<8x128xf32> -> vector<24x128xf32>
    %141 = arith.truncf %140 : vector<24x128xf32> to vector<24x128xbf16>
    %c2_89 = arith.constant 2 : index
    %c0_90 = arith.constant 0 : index
    %c0_91 = arith.constant 0 : index
    %c0_92 = arith.constant 0 : index
    %142 = vector.load %arg4[%c2_89, %c0_90, %c0_91, %c0_92] : memref<6x3x8x24xbf16, #tpu.memory_space<vmem>>, vector<1x1x8x24xbf16>
    %143 = vector.shape_cast %142 : vector<1x1x8x24xbf16> to vector<8x24xbf16>
    %cst_93 = arith.constant dense<0.000000e+00> : vector<8x128xf32>
    %144 = tpu.matmul %143, %141, %cst_93 {dimension_numbers = #tpu.dot_dimension_numbers<[1], [0], [0], [1], [0, 0, 1, 1], [], []>} : vector<8x24xbf16>, vector<24x128xbf16>, vector<8x128xf32> -> vector<8x128xf32>
    %c2_94 = arith.constant 2 : index
    %c1_95 = arith.constant 1 : index
    %c0_96 = arith.constant 0 : index
    %c0_97 = arith.constant 0 : index
    %145 = vector.load %arg4[%c2_94, %c1_95, %c0_96, %c0_97] : memref<6x3x8x24xbf16, #tpu.memory_space<vmem>>, vector<1x1x8x24xbf16>
    %146 = vector.shape_cast %145 : vector<1x1x8x24xbf16> to vector<8x24xbf16>
    %cst_98 = arith.constant dense<0.000000e+00> : vector<8x128xf32>
    %147 = tpu.matmul %146, %141, %cst_98 {dimension_numbers = #tpu.dot_dimension_numbers<[1], [0], [0], [1], [0, 0, 1, 1], [], []>} : vector<8x24xbf16>, vector<24x128xbf16>, vector<8x128xf32> -> vector<8x128xf32>
    %c2_99 = arith.constant 2 : index
    %c2_100 = arith.constant 2 : index
    %c0_101 = arith.constant 0 : index
    %c0_102 = arith.constant 0 : index
    %148 = vector.load %arg4[%c2_99, %c2_100, %c0_101, %c0_102] : memref<6x3x8x24xbf16, #tpu.memory_space<vmem>>, vector<1x1x8x24xbf16>
    %149 = vector.shape_cast %148 : vector<1x1x8x24xbf16> to vector<8x24xbf16>
    %cst_103 = arith.constant dense<0.000000e+00> : vector<8x128xf32>
    %150 = tpu.matmul %149, %141, %cst_103 {dimension_numbers = #tpu.dot_dimension_numbers<[1], [0], [0], [1], [0, 0, 1, 1], [], []>} : vector<8x24xbf16>, vector<24x128xbf16>, vector<8x128xf32> -> vector<8x128xf32>
    %c8_i32_104 = arith.constant 8 : i32
    %151 = tpu.dynamic_rotate %144 by %c8_i32_104 dim 1 : vector<8x128xf32>, i32 -> vector<8x128xf32>
    %152 = arith.mulf %151, %25 : vector<8x128xf32>
    %153 = arith.addf %147, %152 : vector<8x128xf32>
    %c120_i32_105 = arith.constant 120 : i32
    %154 = tpu.dynamic_rotate %150 by %c120_i32_105 dim 1 : vector<8x128xf32>, i32 -> vector<8x128xf32>
    %155 = arith.mulf %154, %29 : vector<8x128xf32>
    %156 = arith.addf %153, %155 : vector<8x128xf32>
    %c2_106 = arith.constant 2 : index
    %c0_107 = arith.constant 0 : index
    %c0_108 = arith.constant 0 : index
    %157 = vector.load %arg5[%c2_106, %c0_107, %c0_108] : memref<6x8x1xf32, #tpu.memory_space<vmem>>, vector<1x8x1xf32>
    %158 = vector.shape_cast %157 : vector<1x8x1xf32> to vector<8x1xf32>
    %159 = vector.broadcast %158 : vector<8x1xf32> to vector<8x128xf32>
    %160 = arith.addf %156, %159 : vector<8x128xf32>
    %cst_109 = arith.constant 0.000000e+00 : f32
    %161 = vector.broadcast %cst_109 : f32 to vector<8x128xf32>
    %162 = arith.maximumf %160, %161 : vector<8x128xf32>
    %c2_110 = arith.constant 2 : index
    %c0_111 = arith.constant 0 : index
    %c0_112 = arith.constant 0 : index
    %163 = vector.load %arg6[%c2_110, %c0_111, %c0_112] : memref<6x4x8xbf16, #tpu.memory_space<vmem>>, vector<1x4x8xbf16>
    %164 = vector.shape_cast %163 : vector<1x4x8xbf16> to vector<4x8xbf16>
    %165 = arith.truncf %162 : vector<8x128xf32> to vector<8x128xbf16>
    %cst_113 = arith.constant dense<0.000000e+00> : vector<4x128xf32>
    %166 = tpu.matmul %164, %165, %cst_113 {dimension_numbers = #tpu.dot_dimension_numbers<[1], [0], [0], [1], [0, 0, 1, 1], [], []>} : vector<4x8xbf16>, vector<8x128xbf16>, vector<4x128xf32> -> vector<4x128xf32>
    %c2_114 = arith.constant 2 : index
    %c0_115 = arith.constant 0 : index
    %c0_116 = arith.constant 0 : index
    %167 = vector.load %arg7[%c2_114, %c0_115, %c0_116] : memref<6x4x1xf32, #tpu.memory_space<vmem>>, vector<1x4x1xf32>
    %168 = vector.shape_cast %167 : vector<1x4x1xf32> to vector<4x1xf32>
    %169 = vector.broadcast %168 : vector<4x1xf32> to vector<4x128xf32>
    %170 = arith.addf %166, %169 : vector<4x128xf32>
    %171 = arith.addf %170, %77 : vector<4x128xf32>
    %cst_117 = arith.constant 0.000000e+00 : f32
    %172 = vector.broadcast %cst_117 : f32 to vector<4x128xf32>
    %173 = arith.maximumf %171, %172 : vector<4x128xf32>
    %c3 = arith.constant 3 : index
    %c0_118 = arith.constant 0 : index
    %c0_119 = arith.constant 0 : index
    %174 = vector.load %arg2[%c3, %c0_118, %c0_119] : memref<6x8x4xbf16, #tpu.memory_space<vmem>>, vector<1x8x4xbf16>
    %175 = vector.shape_cast %174 : vector<1x8x4xbf16> to vector<8x4xbf16>
    %176 = arith.truncf %173 : vector<4x128xf32> to vector<4x128xbf16>
    %cst_120 = arith.constant dense<0.000000e+00> : vector<8x128xf32>
    %177 = tpu.matmul %175, %176, %cst_120 {dimension_numbers = #tpu.dot_dimension_numbers<[1], [0], [0], [1], [0, 0, 1, 1], [], []>} : vector<8x4xbf16>, vector<4x128xbf16>, vector<8x128xf32> -> vector<8x128xf32>
    %c3_121 = arith.constant 3 : index
    %c0_122 = arith.constant 0 : index
    %c0_123 = arith.constant 0 : index
    %178 = vector.load %arg3[%c3_121, %c0_122, %c0_123] : memref<6x8x1xf32, #tpu.memory_space<vmem>>, vector<1x8x1xf32>
    %179 = vector.shape_cast %178 : vector<1x8x1xf32> to vector<8x1xf32>
    %180 = vector.broadcast %179 : vector<8x1xf32> to vector<8x128xf32>
    %181 = arith.addf %177, %180 : vector<8x128xf32>
    %cst_124 = arith.constant 0.000000e+00 : f32
    %182 = vector.broadcast %cst_124 : f32 to vector<8x128xf32>
    %183 = arith.maximumf %181, %182 : vector<8x128xf32>
    %c1_i32_125 = arith.constant 1 : i32
    %184 = tpu.dynamic_rotate %183 by %c1_i32_125 dim 1 : vector<8x128xf32>, i32 -> vector<8x128xf32>
    %185 = arith.mulf %184, %17 : vector<8x128xf32>
    %c127_i32_126 = arith.constant 127 : i32
    %186 = tpu.dynamic_rotate %183 by %c127_i32_126 dim 1 : vector<8x128xf32>, i32 -> vector<8x128xf32>
    %187 = arith.mulf %186, %21 : vector<8x128xf32>
    %188 = tpu.concatenate %185, %183, %187 in 0 : vector<8x128xf32>, vector<8x128xf32>, vector<8x128xf32> -> vector<24x128xf32>
    %189 = arith.truncf %188 : vector<24x128xf32> to vector<24x128xbf16>
    %c3_127 = arith.constant 3 : index
    %c0_128 = arith.constant 0 : index
    %c0_129 = arith.constant 0 : index
    %c0_130 = arith.constant 0 : index
    %190 = vector.load %arg4[%c3_127, %c0_128, %c0_129, %c0_130] : memref<6x3x8x24xbf16, #tpu.memory_space<vmem>>, vector<1x1x8x24xbf16>
    %191 = vector.shape_cast %190 : vector<1x1x8x24xbf16> to vector<8x24xbf16>
    %cst_131 = arith.constant dense<0.000000e+00> : vector<8x128xf32>
    %192 = tpu.matmul %191, %189, %cst_131 {dimension_numbers = #tpu.dot_dimension_numbers<[1], [0], [0], [1], [0, 0, 1, 1], [], []>} : vector<8x24xbf16>, vector<24x128xbf16>, vector<8x128xf32> -> vector<8x128xf32>
    %c3_132 = arith.constant 3 : index
    %c1_133 = arith.constant 1 : index
    %c0_134 = arith.constant 0 : index
    %c0_135 = arith.constant 0 : index
    %193 = vector.load %arg4[%c3_132, %c1_133, %c0_134, %c0_135] : memref<6x3x8x24xbf16, #tpu.memory_space<vmem>>, vector<1x1x8x24xbf16>
    %194 = vector.shape_cast %193 : vector<1x1x8x24xbf16> to vector<8x24xbf16>
    %cst_136 = arith.constant dense<0.000000e+00> : vector<8x128xf32>
    %195 = tpu.matmul %194, %189, %cst_136 {dimension_numbers = #tpu.dot_dimension_numbers<[1], [0], [0], [1], [0, 0, 1, 1], [], []>} : vector<8x24xbf16>, vector<24x128xbf16>, vector<8x128xf32> -> vector<8x128xf32>
    %c3_137 = arith.constant 3 : index
    %c2_138 = arith.constant 2 : index
    %c0_139 = arith.constant 0 : index
    %c0_140 = arith.constant 0 : index
    %196 = vector.load %arg4[%c3_137, %c2_138, %c0_139, %c0_140] : memref<6x3x8x24xbf16, #tpu.memory_space<vmem>>, vector<1x1x8x24xbf16>
    %197 = vector.shape_cast %196 : vector<1x1x8x24xbf16> to vector<8x24xbf16>
    %cst_141 = arith.constant dense<0.000000e+00> : vector<8x128xf32>
    %198 = tpu.matmul %197, %189, %cst_141 {dimension_numbers = #tpu.dot_dimension_numbers<[1], [0], [0], [1], [0, 0, 1, 1], [], []>} : vector<8x24xbf16>, vector<24x128xbf16>, vector<8x128xf32> -> vector<8x128xf32>
    %c8_i32_142 = arith.constant 8 : i32
    %199 = tpu.dynamic_rotate %192 by %c8_i32_142 dim 1 : vector<8x128xf32>, i32 -> vector<8x128xf32>
    %200 = arith.mulf %199, %25 : vector<8x128xf32>
    %201 = arith.addf %195, %200 : vector<8x128xf32>
    %c120_i32_143 = arith.constant 120 : i32
    %202 = tpu.dynamic_rotate %198 by %c120_i32_143 dim 1 : vector<8x128xf32>, i32 -> vector<8x128xf32>
    %203 = arith.mulf %202, %29 : vector<8x128xf32>
    %204 = arith.addf %201, %203 : vector<8x128xf32>
    %c3_144 = arith.constant 3 : index
    %c0_145 = arith.constant 0 : index
    %c0_146 = arith.constant 0 : index
    %205 = vector.load %arg5[%c3_144, %c0_145, %c0_146] : memref<6x8x1xf32, #tpu.memory_space<vmem>>, vector<1x8x1xf32>
    %206 = vector.shape_cast %205 : vector<1x8x1xf32> to vector<8x1xf32>
    %207 = vector.broadcast %206 : vector<8x1xf32> to vector<8x128xf32>
    %208 = arith.addf %204, %207 : vector<8x128xf32>
    %cst_147 = arith.constant 0.000000e+00 : f32
    %209 = vector.broadcast %cst_147 : f32 to vector<8x128xf32>
    %210 = arith.maximumf %208, %209 : vector<8x128xf32>
    %c3_148 = arith.constant 3 : index
    %c0_149 = arith.constant 0 : index
    %c0_150 = arith.constant 0 : index
    %211 = vector.load %arg6[%c3_148, %c0_149, %c0_150] : memref<6x4x8xbf16, #tpu.memory_space<vmem>>, vector<1x4x8xbf16>
    %212 = vector.shape_cast %211 : vector<1x4x8xbf16> to vector<4x8xbf16>
    %213 = arith.truncf %210 : vector<8x128xf32> to vector<8x128xbf16>
    %cst_151 = arith.constant dense<0.000000e+00> : vector<4x128xf32>
    %214 = tpu.matmul %212, %213, %cst_151 {dimension_numbers = #tpu.dot_dimension_numbers<[1], [0], [0], [1], [0, 0, 1, 1], [], []>} : vector<4x8xbf16>, vector<8x128xbf16>, vector<4x128xf32> -> vector<4x128xf32>
    %c3_152 = arith.constant 3 : index
    %c0_153 = arith.constant 0 : index
    %c0_154 = arith.constant 0 : index
    %215 = vector.load %arg7[%c3_152, %c0_153, %c0_154] : memref<6x4x1xf32, #tpu.memory_space<vmem>>, vector<1x4x1xf32>
    %216 = vector.shape_cast %215 : vector<1x4x1xf32> to vector<4x1xf32>
    %217 = vector.broadcast %216 : vector<4x1xf32> to vector<4x128xf32>
    %218 = arith.addf %214, %217 : vector<4x128xf32>
    %219 = arith.addf %218, %173 : vector<4x128xf32>
    %cst_155 = arith.constant 0.000000e+00 : f32
    %220 = vector.broadcast %cst_155 : f32 to vector<4x128xf32>
    %221 = arith.maximumf %219, %220 : vector<4x128xf32>
    %c4 = arith.constant 4 : index
    %c0_156 = arith.constant 0 : index
    %c0_157 = arith.constant 0 : index
    %222 = vector.load %arg2[%c4, %c0_156, %c0_157] : memref<6x8x4xbf16, #tpu.memory_space<vmem>>, vector<1x8x4xbf16>
    %223 = vector.shape_cast %222 : vector<1x8x4xbf16> to vector<8x4xbf16>
    %224 = arith.truncf %221 : vector<4x128xf32> to vector<4x128xbf16>
    %cst_158 = arith.constant dense<0.000000e+00> : vector<8x128xf32>
    %225 = tpu.matmul %223, %224, %cst_158 {dimension_numbers = #tpu.dot_dimension_numbers<[1], [0], [0], [1], [0, 0, 1, 1], [], []>} : vector<8x4xbf16>, vector<4x128xbf16>, vector<8x128xf32> -> vector<8x128xf32>
    %c4_159 = arith.constant 4 : index
    %c0_160 = arith.constant 0 : index
    %c0_161 = arith.constant 0 : index
    %226 = vector.load %arg3[%c4_159, %c0_160, %c0_161] : memref<6x8x1xf32, #tpu.memory_space<vmem>>, vector<1x8x1xf32>
    %227 = vector.shape_cast %226 : vector<1x8x1xf32> to vector<8x1xf32>
    %228 = vector.broadcast %227 : vector<8x1xf32> to vector<8x128xf32>
    %229 = arith.addf %225, %228 : vector<8x128xf32>
    %cst_162 = arith.constant 0.000000e+00 : f32
    %230 = vector.broadcast %cst_162 : f32 to vector<8x128xf32>
    %231 = arith.maximumf %229, %230 : vector<8x128xf32>
    %c1_i32_163 = arith.constant 1 : i32
    %232 = tpu.dynamic_rotate %231 by %c1_i32_163 dim 1 : vector<8x128xf32>, i32 -> vector<8x128xf32>
    %233 = arith.mulf %232, %17 : vector<8x128xf32>
    %c127_i32_164 = arith.constant 127 : i32
    %234 = tpu.dynamic_rotate %231 by %c127_i32_164 dim 1 : vector<8x128xf32>, i32 -> vector<8x128xf32>
    %235 = arith.mulf %234, %21 : vector<8x128xf32>
    %236 = tpu.concatenate %233, %231, %235 in 0 : vector<8x128xf32>, vector<8x128xf32>, vector<8x128xf32> -> vector<24x128xf32>
    %237 = arith.truncf %236 : vector<24x128xf32> to vector<24x128xbf16>
    %c4_165 = arith.constant 4 : index
    %c0_166 = arith.constant 0 : index
    %c0_167 = arith.constant 0 : index
    %c0_168 = arith.constant 0 : index
    %238 = vector.load %arg4[%c4_165, %c0_166, %c0_167, %c0_168] : memref<6x3x8x24xbf16, #tpu.memory_space<vmem>>, vector<1x1x8x24xbf16>
    %239 = vector.shape_cast %238 : vector<1x1x8x24xbf16> to vector<8x24xbf16>
    %cst_169 = arith.constant dense<0.000000e+00> : vector<8x128xf32>
    %240 = tpu.matmul %239, %237, %cst_169 {dimension_numbers = #tpu.dot_dimension_numbers<[1], [0], [0], [1], [0, 0, 1, 1], [], []>} : vector<8x24xbf16>, vector<24x128xbf16>, vector<8x128xf32> -> vector<8x128xf32>
    %c4_170 = arith.constant 4 : index
    %c1_171 = arith.constant 1 : index
    %c0_172 = arith.constant 0 : index
    %c0_173 = arith.constant 0 : index
    %241 = vector.load %arg4[%c4_170, %c1_171, %c0_172, %c0_173] : memref<6x3x8x24xbf16, #tpu.memory_space<vmem>>, vector<1x1x8x24xbf16>
    %242 = vector.shape_cast %241 : vector<1x1x8x24xbf16> to vector<8x24xbf16>
    %cst_174 = arith.constant dense<0.000000e+00> : vector<8x128xf32>
    %243 = tpu.matmul %242, %237, %cst_174 {dimension_numbers = #tpu.dot_dimension_numbers<[1], [0], [0], [1], [0, 0, 1, 1], [], []>} : vector<8x24xbf16>, vector<24x128xbf16>, vector<8x128xf32> -> vector<8x128xf32>
    %c4_175 = arith.constant 4 : index
    %c2_176 = arith.constant 2 : index
    %c0_177 = arith.constant 0 : index
    %c0_178 = arith.constant 0 : index
    %244 = vector.load %arg4[%c4_175, %c2_176, %c0_177, %c0_178] : memref<6x3x8x24xbf16, #tpu.memory_space<vmem>>, vector<1x1x8x24xbf16>
    %245 = vector.shape_cast %244 : vector<1x1x8x24xbf16> to vector<8x24xbf16>
    %cst_179 = arith.constant dense<0.000000e+00> : vector<8x128xf32>
    %246 = tpu.matmul %245, %237, %cst_179 {dimension_numbers = #tpu.dot_dimension_numbers<[1], [0], [0], [1], [0, 0, 1, 1], [], []>} : vector<8x24xbf16>, vector<24x128xbf16>, vector<8x128xf32> -> vector<8x128xf32>
    %c8_i32_180 = arith.constant 8 : i32
    %247 = tpu.dynamic_rotate %240 by %c8_i32_180 dim 1 : vector<8x128xf32>, i32 -> vector<8x128xf32>
    %248 = arith.mulf %247, %25 : vector<8x128xf32>
    %249 = arith.addf %243, %248 : vector<8x128xf32>
    %c120_i32_181 = arith.constant 120 : i32
    %250 = tpu.dynamic_rotate %246 by %c120_i32_181 dim 1 : vector<8x128xf32>, i32 -> vector<8x128xf32>
    %251 = arith.mulf %250, %29 : vector<8x128xf32>
    %252 = arith.addf %249, %251 : vector<8x128xf32>
    %c4_182 = arith.constant 4 : index
    %c0_183 = arith.constant 0 : index
    %c0_184 = arith.constant 0 : index
    %253 = vector.load %arg5[%c4_182, %c0_183, %c0_184] : memref<6x8x1xf32, #tpu.memory_space<vmem>>, vector<1x8x1xf32>
    %254 = vector.shape_cast %253 : vector<1x8x1xf32> to vector<8x1xf32>
    %255 = vector.broadcast %254 : vector<8x1xf32> to vector<8x128xf32>
    %256 = arith.addf %252, %255 : vector<8x128xf32>
    %cst_185 = arith.constant 0.000000e+00 : f32
    %257 = vector.broadcast %cst_185 : f32 to vector<8x128xf32>
    %258 = arith.maximumf %256, %257 : vector<8x128xf32>
    %c4_186 = arith.constant 4 : index
    %c0_187 = arith.constant 0 : index
    %c0_188 = arith.constant 0 : index
    %259 = vector.load %arg6[%c4_186, %c0_187, %c0_188] : memref<6x4x8xbf16, #tpu.memory_space<vmem>>, vector<1x4x8xbf16>
    %260 = vector.shape_cast %259 : vector<1x4x8xbf16> to vector<4x8xbf16>
    %261 = arith.truncf %258 : vector<8x128xf32> to vector<8x128xbf16>
    %cst_189 = arith.constant dense<0.000000e+00> : vector<4x128xf32>
    %262 = tpu.matmul %260, %261, %cst_189 {dimension_numbers = #tpu.dot_dimension_numbers<[1], [0], [0], [1], [0, 0, 1, 1], [], []>} : vector<4x8xbf16>, vector<8x128xbf16>, vector<4x128xf32> -> vector<4x128xf32>
    %c4_190 = arith.constant 4 : index
    %c0_191 = arith.constant 0 : index
    %c0_192 = arith.constant 0 : index
    %263 = vector.load %arg7[%c4_190, %c0_191, %c0_192] : memref<6x4x1xf32, #tpu.memory_space<vmem>>, vector<1x4x1xf32>
    %264 = vector.shape_cast %263 : vector<1x4x1xf32> to vector<4x1xf32>
    %265 = vector.broadcast %264 : vector<4x1xf32> to vector<4x128xf32>
    %266 = arith.addf %262, %265 : vector<4x128xf32>
    %267 = arith.addf %266, %221 : vector<4x128xf32>
    %cst_193 = arith.constant 0.000000e+00 : f32
    %268 = vector.broadcast %cst_193 : f32 to vector<4x128xf32>
    %269 = arith.maximumf %267, %268 : vector<4x128xf32>
    %270 = arith.addf %125, %269 : vector<4x128xf32>
    %271 = arith.truncf %270 : vector<4x128xf32> to vector<4x128xbf16>
    %c0_194 = arith.constant 0 : index
    %c0_195 = arith.constant 0 : index
    %272 = vector.load %arg9[%c0_194, %c0_195] : memref<128x512xbf16, #tpu.memory_space<vmem>>, vector<128x512xbf16>
    %cst_196 = arith.constant dense<0.000000e+00> : vector<4x512xf32>
    %273 = tpu.matmul %271, %272, %cst_196 {dimension_numbers = #tpu.dot_dimension_numbers<[1], [0], [0], [1], [0, 0, 1, 1], [], []>} : vector<4x128xbf16>, vector<128x512xbf16>, vector<4x512xf32> -> vector<4x512xf32>
    %274 = tpu.iota {dimensions = array<i32: 1>} : vector<8x512xi32>
    %c255_i32 = arith.constant 255 : i32
    %275 = vector.broadcast %c255_i32 : i32 to vector<8x512xi32>
    %276 = arith.andi %274, %275 : vector<8x512xi32>
    %c15_i32 = arith.constant 15 : i32
    %277 = vector.broadcast %c15_i32 : i32 to vector<8x512xi32>
    %278 = arith.andi %276, %277 : vector<8x512xi32>
    %c1_i32_197 = arith.constant 1 : i32
    %279 = vector.broadcast %c1_i32_197 : i32 to vector<8x512xi32>
    %280 = arith.cmpi sge, %278, %279 : vector<8x512xi32>
    %281 = arith.extui %280 : vector<8x512xi1> to vector<8x512xi32>
    %282 = arith.sitofp %281 : vector<8x512xi32> to vector<8x512xf32>
    %c15_i32_198 = arith.constant 15 : i32
    %283 = vector.broadcast %c15_i32_198 : i32 to vector<8x512xi32>
    %284 = arith.cmpi slt, %278, %283 : vector<8x512xi32>
    %285 = arith.extui %284 : vector<8x512xi1> to vector<8x512xi32>
    %286 = arith.sitofp %285 : vector<8x512xi32> to vector<8x512xf32>
    %c16_i32 = arith.constant 16 : i32
    %287 = vector.broadcast %c16_i32 : i32 to vector<8x512xi32>
    %288 = arith.cmpi sge, %276, %287 : vector<8x512xi32>
    %289 = arith.extui %288 : vector<8x512xi1> to vector<8x512xi32>
    %290 = arith.sitofp %289 : vector<8x512xi32> to vector<8x512xf32>
    %c240_i32 = arith.constant 240 : i32
    %291 = vector.broadcast %c240_i32 : i32 to vector<8x512xi32>
    %292 = arith.cmpi slt, %276, %291 : vector<8x512xi32>
    %293 = arith.extui %292 : vector<8x512xi1> to vector<8x512xi32>
    %294 = arith.sitofp %293 : vector<8x512xi32> to vector<8x512xf32>
    %c5 = arith.constant 5 : index
    %c0_199 = arith.constant 0 : index
    %c0_200 = arith.constant 0 : index
    %295 = vector.load %arg2[%c5, %c0_199, %c0_200] : memref<6x8x4xbf16, #tpu.memory_space<vmem>>, vector<1x8x4xbf16>
    %296 = vector.shape_cast %295 : vector<1x8x4xbf16> to vector<8x4xbf16>
    %297 = arith.truncf %273 : vector<4x512xf32> to vector<4x512xbf16>
    %cst_201 = arith.constant dense<0.000000e+00> : vector<8x512xf32>
    %298 = tpu.matmul %296, %297, %cst_201 {dimension_numbers = #tpu.dot_dimension_numbers<[1], [0], [0], [1], [0, 0, 1, 1], [], []>} : vector<8x4xbf16>, vector<4x512xbf16>, vector<8x512xf32> -> vector<8x512xf32>
    %c5_202 = arith.constant 5 : index
    %c0_203 = arith.constant 0 : index
    %c0_204 = arith.constant 0 : index
    %299 = vector.load %arg3[%c5_202, %c0_203, %c0_204] : memref<6x8x1xf32, #tpu.memory_space<vmem>>, vector<1x8x1xf32>
    %300 = vector.shape_cast %299 : vector<1x8x1xf32> to vector<8x1xf32>
    %301 = vector.broadcast %300 : vector<8x1xf32> to vector<8x512xf32>
    %302 = arith.addf %298, %301 : vector<8x512xf32>
    %cst_205 = arith.constant 0.000000e+00 : f32
    %303 = vector.broadcast %cst_205 : f32 to vector<8x512xf32>
    %304 = arith.maximumf %302, %303 : vector<8x512xf32>
    %c1_i32_206 = arith.constant 1 : i32
    %305 = tpu.dynamic_rotate %304 by %c1_i32_206 dim 1 : vector<8x512xf32>, i32 -> vector<8x512xf32>
    %306 = arith.mulf %305, %282 : vector<8x512xf32>
    %c511_i32_207 = arith.constant 511 : i32
    %307 = tpu.dynamic_rotate %304 by %c511_i32_207 dim 1 : vector<8x512xf32>, i32 -> vector<8x512xf32>
    %308 = arith.mulf %307, %286 : vector<8x512xf32>
    %309 = tpu.concatenate %306, %304, %308 in 0 : vector<8x512xf32>, vector<8x512xf32>, vector<8x512xf32> -> vector<24x512xf32>
    %310 = arith.truncf %309 : vector<24x512xf32> to vector<24x512xbf16>
    %c5_208 = arith.constant 5 : index
    %c0_209 = arith.constant 0 : index
    %c0_210 = arith.constant 0 : index
    %c0_211 = arith.constant 0 : index
    %311 = vector.load %arg4[%c5_208, %c0_209, %c0_210, %c0_211] : memref<6x3x8x24xbf16, #tpu.memory_space<vmem>>, vector<1x1x8x24xbf16>
    %312 = vector.shape_cast %311 : vector<1x1x8x24xbf16> to vector<8x24xbf16>
    %cst_212 = arith.constant dense<0.000000e+00> : vector<8x512xf32>
    %313 = tpu.matmul %312, %310, %cst_212 {dimension_numbers = #tpu.dot_dimension_numbers<[1], [0], [0], [1], [0, 0, 1, 1], [], []>} : vector<8x24xbf16>, vector<24x512xbf16>, vector<8x512xf32> -> vector<8x512xf32>
    %c5_213 = arith.constant 5 : index
    %c1_214 = arith.constant 1 : index
    %c0_215 = arith.constant 0 : index
    %c0_216 = arith.constant 0 : index
    %314 = vector.load %arg4[%c5_213, %c1_214, %c0_215, %c0_216] : memref<6x3x8x24xbf16, #tpu.memory_space<vmem>>, vector<1x1x8x24xbf16>
    %315 = vector.shape_cast %314 : vector<1x1x8x24xbf16> to vector<8x24xbf16>
    %cst_217 = arith.constant dense<0.000000e+00> : vector<8x512xf32>
    %316 = tpu.matmul %315, %310, %cst_217 {dimension_numbers = #tpu.dot_dimension_numbers<[1], [0], [0], [1], [0, 0, 1, 1], [], []>} : vector<8x24xbf16>, vector<24x512xbf16>, vector<8x512xf32> -> vector<8x512xf32>
    %c5_218 = arith.constant 5 : index
    %c2_219 = arith.constant 2 : index
    %c0_220 = arith.constant 0 : index
    %c0_221 = arith.constant 0 : index
    %317 = vector.load %arg4[%c5_218, %c2_219, %c0_220, %c0_221] : memref<6x3x8x24xbf16, #tpu.memory_space<vmem>>, vector<1x1x8x24xbf16>
    %318 = vector.shape_cast %317 : vector<1x1x8x24xbf16> to vector<8x24xbf16>
    %cst_222 = arith.constant dense<0.000000e+00> : vector<8x512xf32>
    %319 = tpu.matmul %318, %310, %cst_222 {dimension_numbers = #tpu.dot_dimension_numbers<[1], [0], [0], [1], [0, 0, 1, 1], [], []>} : vector<8x24xbf16>, vector<24x512xbf16>, vector<8x512xf32> -> vector<8x512xf32>
    %c16_i32_223 = arith.constant 16 : i32
    %320 = tpu.dynamic_rotate %313 by %c16_i32_223 dim 1 : vector<8x512xf32>, i32 -> vector<8x512xf32>
    %321 = arith.mulf %320, %290 : vector<8x512xf32>
    %322 = arith.addf %316, %321 : vector<8x512xf32>
    %c496_i32_224 = arith.constant 496 : i32
    %323 = tpu.dynamic_rotate %319 by %c496_i32_224 dim 1 : vector<8x512xf32>, i32 -> vector<8x512xf32>
    %324 = arith.mulf %323, %294 : vector<8x512xf32>
    %325 = arith.addf %322, %324 : vector<8x512xf32>
    %c5_225 = arith.constant 5 : index
    %c0_226 = arith.constant 0 : index
    %c0_227 = arith.constant 0 : index
    %326 = vector.load %arg5[%c5_225, %c0_226, %c0_227] : memref<6x8x1xf32, #tpu.memory_space<vmem>>, vector<1x8x1xf32>
    %327 = vector.shape_cast %326 : vector<1x8x1xf32> to vector<8x1xf32>
    %328 = vector.broadcast %327 : vector<8x1xf32> to vector<8x512xf32>
    %329 = arith.addf %325, %328 : vector<8x512xf32>
    %cst_228 = arith.constant 0.000000e+00 : f32
    %330 = vector.broadcast %cst_228 : f32 to vector<8x512xf32>
    %331 = arith.maximumf %329, %330 : vector<8x512xf32>
    %c5_229 = arith.constant 5 : index
    %c0_230 = arith.constant 0 : index
    %c0_231 = arith.constant 0 : index
    %332 = vector.load %arg6[%c5_229, %c0_230, %c0_231] : memref<6x4x8xbf16, #tpu.memory_space<vmem>>, vector<1x4x8xbf16>
    %333 = vector.shape_cast %332 : vector<1x4x8xbf16> to vector<4x8xbf16>
    %334 = arith.truncf %331 : vector<8x512xf32> to vector<8x512xbf16>
    %cst_232 = arith.constant dense<0.000000e+00> : vector<4x512xf32>
    %335 = tpu.matmul %333, %334, %cst_232 {dimension_numbers = #tpu.dot_dimension_numbers<[1], [0], [0], [1], [0, 0, 1, 1], [], []>} : vector<4x8xbf16>, vector<8x512xbf16>, vector<4x512xf32> -> vector<4x512xf32>
    %c5_233 = arith.constant 5 : index
    %c0_234 = arith.constant 0 : index
    %c0_235 = arith.constant 0 : index
    %336 = vector.load %arg7[%c5_233, %c0_234, %c0_235] : memref<6x4x1xf32, #tpu.memory_space<vmem>>, vector<1x4x1xf32>
    %337 = vector.shape_cast %336 : vector<1x4x1xf32> to vector<4x1xf32>
    %338 = vector.broadcast %337 : vector<4x1xf32> to vector<4x512xf32>
    %339 = arith.addf %335, %338 : vector<4x512xf32>
    %340 = arith.addf %339, %273 : vector<4x512xf32>
    %cst_236 = arith.constant 0.000000e+00 : f32
    %341 = vector.broadcast %cst_236 : f32 to vector<4x512xf32>
    %342 = arith.maximumf %340, %341 : vector<4x512xf32>
    %c0_237 = arith.constant 0 : index
    %c0_238 = arith.constant 0 : index
    %c0_239 = arith.constant 0 : index
    %343 = vector.load %arg10[%c0_237, %c0_238, %c0_239] : memref<1x4x512xf32, #tpu.memory_space<vmem>>, vector<1x4x512xf32>
    %344 = vector.shape_cast %343 : vector<1x4x512xf32> to vector<4x512xf32>
    %345 = vector.shape_cast %342 : vector<4x512xf32> to vector<1x4x512xf32>
    tpu.vector_store %arg10[%c0_237, %c0_238, %c0_239], %345 {strides = array<i32>} : memref<1x4x512xf32, #tpu.memory_space<vmem>>, vector<1x4x512xf32>,
    return
  }
  func.func @transform_0(%arg0: i32) -> (i32, i32, i32) {
    %c0_i32 = arith.constant 0 : i32
    %c0_i32_0 = arith.constant 0 : i32
    %c0_i32_1 = arith.constant 0 : i32
    return %arg0, %c0_i32, %c0_i32_0 : i32, i32, i32
  }
  func.func @transform_1(%arg0: i32) -> (i32, i32, i32) {
    %c0_i32 = arith.constant 0 : i32
    %c0_i32_0 = arith.constant 0 : i32
    %c0_i32_1 = arith.constant 0 : i32
    %c0_i32_2 = arith.constant 0 : i32
    return %c0_i32, %c0_i32_0, %c0_i32_1 : i32, i32, i32
  }
  func.func @transform_2(%arg0: i32) -> (i32, i32, i32) {
    %c0_i32 = arith.constant 0 : i32
    %c0_i32_0 = arith.constant 0 : i32
    %c0_i32_1 = arith.constant 0 : i32
    %c0_i32_2 = arith.constant 0 : i32
    return %c0_i32, %c0_i32_0, %c0_i32_1 : i32, i32, i32
  }
  func.func @transform_3(%arg0: i32) -> (i32, i32, i32, i32) {
    %c0_i32 = arith.constant 0 : i32
    %c0_i32_0 = arith.constant 0 : i32
    %c0_i32_1 = arith.constant 0 : i32
    %c0_i32_2 = arith.constant 0 : i32
    %c0_i32_3 = arith.constant 0 : i32
    return %c0_i32, %c0_i32_0, %c0_i32_1, %c0_i32_2 : i32, i32, i32, i32
  }
  func.func @transform_4(%arg0: i32) -> (i32, i32, i32) {
    %c0_i32 = arith.constant 0 : i32
    %c0_i32_0 = arith.constant 0 : i32
    %c0_i32_1 = arith.constant 0 : i32
    %c0_i32_2 = arith.constant 0 : i32
    return %c0_i32, %c0_i32_0, %c0_i32_1 : i32, i32, i32
  }
  func.func @transform_5(%arg0: i32) -> (i32, i32, i32) {
    %c0_i32 = arith.constant 0 : i32
    %c0_i32_0 = arith.constant 0 : i32
    %c0_i32_1 = arith.constant 0 : i32
    %c0_i32_2 = arith.constant 0 : i32
    return %c0_i32, %c0_i32_0, %c0_i32_1 : i32, i32, i32
  }
  func.func @transform_6(%arg0: i32) -> (i32, i32, i32) {
    %c0_i32 = arith.constant 0 : i32
    %c0_i32_0 = arith.constant 0 : i32
    %c0_i32_1 = arith.constant 0 : i32
    %c0_i32_2 = arith.constant 0 : i32
    return %c0_i32, %c0_i32_0, %c0_i32_1 : i32, i32, i32
  }
  func.func @transform_7(%arg0: i32) -> (i32, i32) {
    %c0_i32 = arith.constant 0 : i32
    %c0_i32_0 = arith.constant 0 : i32
    %c0_i32_1 = arith.constant 0 : i32
    return %c0_i32, %c0_i32_0 : i32, i32
  }
  func.func @transform_8(%arg0: i32) -> (i32, i32) {
    %c0_i32 = arith.constant 0 : i32
    %c0_i32_0 = arith.constant 0 : i32
    %c0_i32_1 = arith.constant 0 : i32
    return %c0_i32, %c0_i32_0 : i32, i32
  }
  func.func @transform_9(%arg0: i32) -> (i32, i32, i32) {
    %c0_i32 = arith.constant 0 : i32
    %c0_i32_0 = arith.constant 0 : i32
    %c0_i32_1 = arith.constant 0 : i32
    return %arg0, %c0_i32, %c0_i32_0 : i32, i32, i32
  }
}

</mosaic_0001>

<bundles_post_ra>
// kernel: tpu_custom_call.1
= control target key start
LH: loop header
LB: loop body
LE: loop exit
PB: predicated region body
PF: predicated region fallthrough
CT: control target
= control target key end

     0   :  { %14 = vsyncpa [#allocation3], 0  ;;  %s4733_s0 = inlined_call_operand.vmem [shape: f32[2,4,512], index: 0, kind: input, shape index: {}]   ;;  %s4734_s1 = inlined_call_operand.vmem [shape: bf16[6,8,4], index: 1, kind: input, shape index: {}]   ;;  %s4735_s2 = inlined_call_operand.vmem [shape: f32[6,8,1], index: 2, kind: input, shape index: {}]   ;;  %s4736_s3 = inlined_call_operand.vmem [shape: bf16[6,3,8,24], index: 3, kind: input, shape index: {}]   ;;  %s4737_s4 = inlined_call_operand.vmem [shape: f32[6,8,1], index: 4, kind: input, shape index: {}]   ;;  %s4738_s5 = inlined_call_operand.vmem [shape: bf16[6,4,8], index: 5, kind: input, shape index: {}]   ;;  %s4739_s6 = inlined_call_operand.vmem [shape: f32[6,4,1], index: 6, kind: input, shape index: {}]   ;;  %s4740_s7 = inlined_call_operand.hbm [shape: bf16[512,128], index: 7, kind: input, shape index: {}]   ;;  %s4741_s8 = inlined_call_operand.hbm [shape: bf16[128,512], index: 8, kind: input, shape index: {}]   ;;  %s4742_s9 = inlined_call_operand.hbm [shape: f32[2,4,512], index: 9, kind: output, shape index: {}]  }
   0x1   :  { %15 = vsyncpa [#allocation6], 0 }
   0x2   :  { %16 = vsyncpa [#allocation4], 0 }
   0x3   :  { %18 = vsyncpa [#allocation4 + $0x1], 0  ;;  %s4028_s30 = smov 0   ;;  %s4030_s10 = smov 0  }
   0x4   :  { %s4032_s11 = smov 0   ;;  %s4034_s12 = smov 0  }
   0x5 LB: > { %4749 = sst [smem:[#allocation11_spill]] %s3956_s11  ;;  %s4049_s13 = sadd.s32 4294967295, %s3960_s12   ;;  %s3960_s12 = sphi %s4034_s12, %s4763_s12   ;;  %s3956_s11 = sphi %s4032_s11, %s4768_s11   ;;  %s3952_s10 = sphi %s4030_s10, %s4767_s10   ;;  %s3948_s30 = sphi %s4028_s30, %s4766_s30  }
   0x6   : > { %s3203_s14 = sadd.s32 4294967294, %s3960_s12   ;;  %s4053_s15 = sadd.s32 1, %s3960_s12  }
   0x7   : > { %4750 = sst [smem:[#allocation12_spill]] %s4053_s15  ;;  %s225_s16 = sadd.s32 1, %s3956_s11 }
   0x8   : > { %s222_s17 = ssub.s32 %s3960_s12, %s4053_s15  ;;  %p235_p0 = scmp.ne.s32.totalorder %s3956_s11, %s3952_s10 }
   0x9   : > { %p223_p1 = scmp.eq.s32.totalorder %s222_s17, 0  ;;  %p236_p2 = scmp.eq.s32.totalorder %s4049_s13, 1 }
   0xa   : > { %p241_p3 = scmp.ne.s32.totalorder %s3952_s10, %s3948_s30  ;;  %p242_p4 = scmp.eq.s32.totalorder %s3203_s14, 1 }
   0xb   : > { %s4064_s18 = scalar_select %p223_p1, %s3956_s11, %s225_s16  }
   0xc   : > { %p4066_p5 = por %p236_p2, %p235_p0  ;;  %p4070_p6 = por %p242_p4, %p241_p3 }
   0xd   : > { %4751 = sst [smem:[#allocation13_spill]] %s4064_s18  ;;  %p3204_p7 = scmp.ge.s32.totalorder %s3960_s12, 1 }
   0xe   : > { %s4752_s19 = scalar_select %p4066_p5, 1, 0 }
   0xf   : > { %s4753_s20 = scalar_select %p4070_p6, 1, 0 }
  0x10   : > { %p249_p8 = scmp.lt.s32.totalorder %s3960_s12, 3  ;;  %p4743_p9 = scmp.eq.s32.totalorder %s4049_s13, 0 }
  0x11   : > { %s3962_s22 = smov [#allocation2]   ;;  %s3963_s25 = smov [#allocation5]  }
  0x12   : > { %p4077_p10 = pnand %p3204_p7, %p249_p8  ;;  %s279_s23 = sshll.u32 %s3962_s22, 4  ;;  %s280_s23 = int_to_ptr.vmem [resolvable:$true] %s279_s23 }
  0x13   : > { %s292_s26 = sshll.u32 %s3963_s25, 4  ;;  %s3834_s29 = scalar_lea.hbm %s4740_s7, 4096  ;;  %s4089_s26 = int_to_ptr.vmem [resolvable:$true] %s292_s26 }
  0x14   : > { %s4754_s21 = scalar_select %p4077_p10, 1, 0 }
  0x15   : > { %p3687_p11 = pneg %p4077_p10  ;;  %p3835_p13 = scmp.ne.s32.totalorder %s4740_s7, %s3834_s29 }
  0x16   : > { %p3841_p3 = scmp.lt.u32.totalorder %s3834_s29, %s4740_s7 }
  0x17   : > { %p4085_p12 = pnand %p4743_p9, %p3687_p11 }
  0x19   : > { %p3836_p0 = pneg %p4085_p12 }
  0x1b   : > { %p3837_p1 = pnand %p3836_p0, %p3835_p13 }
  0x1d   : > { %p3838_p2 = pneg %p3837_p1 }
  0x1f   : > { %p3843_p4 = pnand %p3841_p3, %p3838_p2 }
  0x21   : > { %3846 = shalt.err (!%p3843_p4)
}
  0x22   : > { %s3847_s25 = scalar_lea.vmem %s280_s23, 4096  ;;  %p3855_p9 = scmp.lt.s32.totalorder %s280_s23, %s280_s23 }
  0x23   : > { %p3848_p7 = scmp.ne.s32.totalorder %s280_s23, %s3847_s25  ;;  %p3856_p6 = scmp.lt.s32.totalorder %s3847_s25, %s3847_s25 }
  0x25   : > { %p3850_p8 = pnand %p3848_p7, %p3836_p0  ;;  %p3857_p5 = por %p3856_p6, %p3855_p9 }
  0x27   : > { %p3851_p11 = pneg %p3850_p8 }
  0x29   : > { %p3858_p10 = pnand %p3857_p5, %p3851_p11 }
  0x2b   : > { %3861 = shalt.err (!%p3858_p10)
}
  0x2c   : > { %s3964_s27 = smov 64   ;;  %s3965_s28 = smov 4  }
  0x2d   : > { %3690 = dma.hbm_to_vmem [thread:$0]  (!%p4085_p12), %s4740_s7, 4096, %s280_s23, [#allocation3], %s3964_s27, %s3964_s27, %s3965_s28  }
  0x2e   : > { %s3862_s22 = scalar_lea.hbm %s4741_s8, 4096 }
  0x2f   : > { %p3863_p13 = scmp.ne.s32.totalorder %s4741_s8, %s3862_s22  ;;  %p3869_p9 = scmp.lt.u32.totalorder %s3862_s22, %s4741_s8 }
  0x31   : > { %p3865_p5 = pnand %p3863_p13, %p3836_p0 }
  0x33   : > { %p3866_p6 = pneg %p3865_p5 }
  0x35   : > { %p3871_p10 = pnand %p3869_p9, %p3866_p6 }
  0x37   : > { %3874 = shalt.err (!%p3871_p10)
}
  0x38   : > { %s3875_s23 = scalar_lea.vmem %s4089_s26, 4096  ;;  %p3883_p4 = scmp.lt.s32.totalorder %s4089_s26, %s4089_s26 }
  0x39   : > { %p3876_p1 = scmp.ne.s32.totalorder %s4089_s26, %s3875_s23  ;;  %p3884_p7 = scmp.lt.s32.totalorder %s3875_s23, %s3875_s23 }
  0x3b   : > { %p3878_p2 = pnand %p3876_p1, %p3836_p0  ;;  %p3885_p8 = por %p3884_p7, %p3883_p4 }
  0x3d   : > { %p3879_p3 = pneg %p3878_p2 }
  0x3f   : > { %p3886_p11 = pnand %p3885_p8, %p3879_p3 }
  0x41   : > { %3889 = shalt.err (!%p3886_p11)
}
  0x42   : > { %s3966_s11 = smov 256   ;;  %s3967_s15 = smov 16  }
  0x43   : > { %3693 = dma.hbm_to_vmem [thread:$0]  (!%p4085_p12), %s4741_s8, 4096, %s4089_s26, [#allocation6], %s3966_s11, %s3966_s11, %s3967_s15  }
  0x44   : > { %p4756_p13 = scmp.ne.s32.totalorder %s4754_s21, 0 }
  0x45   : > { %p4757_p0 = scmp.eq.s32.totalorder (!%p4756_p13), %s4049_s13, 0 }
  0x46   : > { %316 = sbr.rel (%p4756_p13) target bundleno = 5720 (0x1658), region = 56 }
  0x4d   : > { %3935 = dma.done.wait (%p4757_p0), [#allocation3], 4096   ;;  %p4758_p5 = pmov %p4757_p0 }
  0x4e   : > { %p4759_p6 = pmov %p4757_p0 }
  0x4f   : > { %3937 = vsyncadd (%p4758_p5), [#allocation3], 4294963200 }
  0x50   : > { %3939 = dma.done.wait (%p4759_p6), [#allocation6], 4096   ;;  %p4760_p9 = pmov %p4757_p0 }
  0x51   : > { %p356_p10 = scmp.lt.s32.totalorder %s4049_s13, 1  ;;  %s3968_s14 = smov 127   ;;  %v3754_v4 = vld [vmem:[#allocation2 + $0x40] sm:$0xff]   ;;  %v3758_v8 = vld [vmem:[#allocation2 + $0x48] sm:$0xff]   ;;  %v3762_v12 = vld [vmem:[#allocation2 + $0x50] sm:$0xff]   ;;  %v378_v22 = vlaneseq  ;;  %vm3971_vm2 = vmmov 0  }
  0x52   : > { %3941 = vsyncadd (%p4760_p9), [#allocation6], 4294963200  ;;  %v3755_v5 = vld [vmem:[#allocation2] sm:$0xff]   ;;  %3388 = vmatprep.subr.bf16.mxu0 %v3754_v4  ;;  %v3759_v9 = vld [vmem:[#allocation2 + $0x8] sm:$0xff]   ;;  %s3969_s16 = smov 112   ;;  %vm796_vm3 = vcmask 1041408  }
  0x53   : > { %s357_s24 = scalar_select %p356_p10, %s4049_s13, 1  ;;  %v3756_v6 = vld [vmem:[#allocation2 + $0xc0] sm:$0xff]   ;;  %3389 = vmatpush3.bf16.msra.mxu0 %v3755_v5  ;;  %v3760_v10 = vld [vmem:[#allocation2 + $0xc8] sm:$0xff]   ;;  %v3763_v13 = vld [vmem:[#allocation2 + $0x10] sm:$0xff]   ;;  %v4167_v26 = vand.u32 127, %v378_v22  ;;  %vm792_vm4 = vcmask 31744  }
  0x54   : > { %v3757_v7 = vld [vmem:[#allocation2 + $0x80] sm:$0xff]   ;;  %3410 = vmatprep.subr.bf16.mxu1 %v3756_v6  ;;  %3390 = vmatprep.subr.bf16.mxu0 %v3758_v8  ;;  %v3761_v11 = vld [vmem:[#allocation2 + $0x88] sm:$0xff]   ;;  %v3764_v14 = vld [vmem:[#allocation2 + $0xd0] sm:$0xff]   ;;  %v3970_v6 = vmov 0.0   ;;  %v3972_v8 = vmov 0   ;;  %s3973_s18 = smov 1  }
  0x55   : > { %s3386_s26 = sshll.u32 %s357_s24, 4  ;;  %3411 = vmatpush3.bf16.msra.mxu1 %v3757_v7  ;;  %v3765_v15 = vld [vmem:[#allocation2 + $0x90] sm:$0xff]   ;;  %v3766_v16 = vld [vmem:[#allocation2 + $0x58] sm:$0xff]   ;;  %v3770_v20 = vld [vmem:[#allocation2 + $0x60] sm:$0xff]   ;;  %vm380_vm0 = vcmp.lt.s32.totalorder %v4167_v26, 127  ;;  %vm409_vm1 = vcmp.lt.s32.totalorder %v4167_v26, 112  ;;  %3750 = vset.pattern.permute.xlu0 %v3972_v8 }
  0x56   : > { %s360_s29 = scalar_lea.vmem %s4733_s0, %s3386_s26  ;;  %3412 = vmatprep.subr.bf16.mxu1 %v3760_v10  ;;  %v3767_v17 = vld [vmem:[#allocation2 + $0x18] sm:$0xff]   ;;  %v3771_v21 = vld [vmem:[#allocation2 + $0x20] sm:$0xff]   ;;  %v3774_v25 = vld [vmem:[#allocation2 + $0x68] sm:$0xff]   ;;  %3751 = vset.pattern.permute.xlu1 %v3972_v8  ;;  %vm854_vm7 = vcmask 1043456   ;;  %vm850_vm8 = vcmask 195584   ;;  %s3974_s17 = smov 8  }
  0x57   : > { %v4153_v0 = vld [vmem:[%s360_s29 + $0x8] sm:$0xff]  ;;  %v4155_v1 = vld [vmem:[%s360_s29] sm:$0xff]  ;;  %3391 = vmatpush3.bf16.msra.mxu0 %v3759_v9  ;;  %v3768_v18 = vld [vmem:[#allocation2 + $0xd8] sm:$0xff]   ;;  %s3975_s22 = smov 120   ;;  %vm1011_vm11 = vcmask 64512   ;;  %vm2621_vm13 = vcmp.lt.s32.totalorder %v4167_v26, 1 }
  0x58   : > { %374 = vrot.lane.b32.xlu1 %v4153_v0, %s3968_s14  ;;  %370 = vrot.lane.b32.xlu0 %v4155_v1, %s3968_s14  ;;  %v367_v2 = vcombine.high %v4153_v0, %v4153_v0  ;;  %v366_v3 = vcombine.high %v4155_v1, %v4155_v1  ;;  %v3769_v19 = vld [vmem:[#allocation2 + $0x98] sm:$0xff]   ;;  %v3772_v23 = vld [vmem:[#allocation2 + $0xe0] sm:$0xff]   ;;  %v3775_v27 = vld [vmem:[#allocation2 + $0x28] sm:$0xff]   ;;  %s3976_s26 = smov 16   ;;  %s353_s21 = sand.u32 1, %s3952_s10  }
  0x59   : > { %3413 = vmatpush3.bf16.msra.mxu1 %v3761_v11  ;;  %3392 = vmatprep.subr.bf16.mxu0 %v3762_v12  ;;  %v3773_v24 = vld [vmem:[#allocation2 + $0xa0] sm:$0xff]   ;;  %v3776_v28 = vld [vmem:[#allocation2 + $0xe8] sm:$0xff]   ;;  %v3778_v32 = vld [vmem:[#allocation2 + $0x70] sm:$0xff]   ;;  %s3211_s29 = sshll.u32 %s353_s21, 4  ;;  %s3387_s25 = sshll.u32 %s4049_s13, 8 }
  0x5a   : > { %3414 = vmatprep.subr.bf16.mxu1 %v3764_v14  ;;  %v3777_v31 = vld [vmem:[#allocation2 + $0xa8] sm:$0xff]   ;;  %v3779_v33 = vld [vmem:[#allocation2 + $0x30] sm:$0xff]   ;;  %v3782_v38 = vld [vmem:[#allocation2 + $0x78] sm:$0xff]   ;;  %s355_s23 = scalar_lea.vmem [#allocation7], %s3211_s29  ;;  %s4689_s15 = scalar_lea.hbm %s4742_s9, %s3387_s25 }
  0x5b   : > { %3393 = vmatpush3.bf16.msra.mxu0 %v3763_v13  ;;  %v3780_v34 = vld [vmem:[#allocation2 + $0xf0] sm:$0xff]   ;;  %v3783_v39 = vld [vmem:[#allocation2 + $0x38] sm:$0xff]   ;;  %v786_v7 = vld [vmem:[%s4735_s2] sm:$0xff]  ;;  %s3108_s13 = scalar_lea.sflag [#allocation4], %s353_s21  ;;  %p4761_p1 = scmp.ne.s32.totalorder %s4752_s19, 0 }
  0x5c   : > { %376 = vrot.lane.b32.xlu1 %v367_v2, %s3968_s14  ;;  %372 = vrot.lane.b32.xlu0 %v366_v3, %s3968_s14  ;;  %v3781_v37 = vld [vmem:[#allocation2 + $0xb0] sm:$0xff]   ;;  %v3784_v44 = vld [vmem:[#allocation2 + $0xf8] sm:$0xff]   ;;  %v995_v9 = vld [vmem:[%s4737_s4] sm:$0xff]  ;;  %s3977_s24 = smov [#allocation7]  }
  0x5d   : > { %3415 = vmatpush3.bf16.msra.mxu1 %v3765_v15  ;;  %3394 = vmatprep.subr.bf16.mxu0 %v3766_v16  ;;  %v3785_v48 = vld [vmem:[#allocation2 + $0xb8] sm:$0xff]  }
  0x5e   : > { %3416 = vmatprep.subr.bf16.mxu1 %v3768_v18 }
  0x5f   : > { %3395 = vmatpush3.bf16.msra.mxu0 %v3767_v17 }
  0x60   : > { %3396 = vmatprep.subr.bf16.mxu0 %v3770_v20 }
  0x61   : > { %3417 = vmatpush3.bf16.msra.mxu1 %v3769_v19 }
  0x62   : > { %3418 = vmatprep.subr.bf16.mxu1 %v3772_v23  ;;  %v784_v23 = vld [vmem:[%s4734_s1] sm:$0xf] }
  0x63   : > { %3397 = vmatpush3.bf16.msra.mxu0 %v3771_v21 }
  0x64   : > { %3398 = vmatprep.subr.bf16.mxu0 %v3774_v25 }
  0x65   : > { %3419 = vmatpush3.bf16.msra.mxu1 %v3773_v24 }
  0x66   : > { %3420 = vmatprep.subr.bf16.mxu1 %v3776_v28 }
  0x67   : > { %3399 = vmatpush3.bf16.msra.mxu0 %v3775_v27 }
  0x68   : > { %3400 = vmatprep.subr.bf16.mxu0 %v3778_v32  ;;  %v770_v32 = vand.u32 63, %v4167_v26 }
  0x69   : > { %3421 = vmatpush3.bf16.msra.mxu1 %v3777_v31 }
  0x6a   : > { %3422 = vmatprep.subr.bf16.mxu1 %v3780_v34  ;;  %vm778_vm9 = vcmp.ge.s32.totalorder %v770_v32, 8  ;;  %vm781_vm10 = vcmp.lt.s32.totalorder %v770_v32, 56 }
  0x6b   : > { %3401 = vmatpush3.bf16.msra.mxu0 %v3779_v33  ;;  %v771_v33 = vand.u32 7, %v770_v32  ;;  %v3271_v32 = vld [vmem:[%s4735_s2 + $0x10] sm:$0xff] }
  0x6c   : > { %3402 = vmatprep.subr.bf16.mxu0 %v3782_v38 }
  0x6d   : > { %3423 = vmatpush3.bf16.msra.mxu1 %v3781_v37  ;;  %vm772_vm5 = vcmp.ge.s32.totalorder %v771_v33, 1  ;;  %vm775_vm6 = vcmp.lt.s32.totalorder %v771_v33, 7 }
  0x6e   : > { %3424 = vmatprep.subr.bf16.mxu1 %v3784_v44  ;;  %v4223_v34 = vsel %vm772_vm5, 1.0, %v3970_v6  ;;  %v4227_v37 = vsel %vm775_vm6, 1.0, %v3970_v6  ;;  %v3253_v44 = vld [vmem:[%s4736_s3 + $0x8] sm:$0xf] }
  0x6f   : > { %3403 = vmatpush3.bf16.msra.mxu0 %v3783_v39 }
  0x70   : > { %3497 = vmatprep.subr.bf16.mxu0 %v3970_v6 }
  0x71   : > { %3425 = vmatpush3.bf16.msra.mxu1 %v3785_v48 }
  0x72   : > { %3503 = vmatprep.subr.bf16.mxu1 %v3970_v6 }
  0xca   : > { %v375_v29 = vpop.permute.xlu1 %374  ;;  %v371_v30 = vpop.permute.xlu0 %370 }
  0xce   : > { %v377_v35 = vpop.permute.xlu1 %376  ;;  %v373_v36 = vpop.permute.xlu0 %372 }
  0xcf   : > { %v381_v40 = vsel %vm380_vm0, %v375_v29, %v377_v35  ;;  %v384_v41 = vsel %vm380_vm0, %v377_v35, %v371_v30  ;;  %v382_v42 = vsel %vm380_vm0, %v373_v36, %v375_v29  ;;  %v383_v43 = vsel %vm380_vm0, %v371_v30, %v373_v36 }
  0xd0   : > { %v390_v45 = vcombine.low %v381_v40, %v384_v41  ;;  %v389_v46 = vcombine.low %v383_v43, %v382_v42  ;;  %v849_v43 = vld [vmem:[%s4736_s3] sm:$0xf] }
  0xd2   : > { %v393_v47 = vmax.f32 %v4155_v1, %v389_v46  ;;  %v394_v50 = vmax.f32 %v4153_v0, %v390_v45  ;;  %v3252_v45 = vld [vmem:[%s4736_s3 + $0x4] sm:$0xf] }
  0xd4   : > { %401 = vrot.lane.b32.xlu0 %v393_v47, %s3969_s16  ;;  %v397_v49 = vcombine.high %v393_v47, %v393_v47  ;;  %v398_v51 = vcombine.high %v394_v50, %v394_v50 }
  0xd6   : > { %403 = vrot.lane.b32.xlu1 %v397_v49, %s3969_s16 }
  0xd8   : > { %405 = vrot.lane.b32.xlu0 %v394_v50, %s3969_s16 }
  0xda   : > { %407 = vrot.lane.b32.xlu1 %v398_v51, %s3969_s16 }
  0xdc   : > { %789 = vperm.xlu0 %3750, %v786_v7  }
  0xe0   : > { %998 = vperm.xlu0 %3750, %v995_v9  }
 0x146   : > { %v402_v52 = vpop.permute.xlu0 %401 }
 0x148   : > { %v404_v53 = vpop.permute.xlu1 %403 }
 0x149   : > { %v412_v55 = vsel %vm409_vm1, %v402_v52, %v404_v53 }
 0x14a   : > { %v406_v54 = vpop.permute.xlu0 %405 }
 0x14b   : > { %v411_v56 = vsel %vm409_vm1, %v404_v53, %v406_v54 }
 0x14c   : > { %v418_v57 = vcombine.low %v412_v55, %v411_v56  ;;  %v408_v58 = vpop.permute.xlu1 %407  ;;  %v1005_v55 = vld [vmem:[%s4739_s6] sm:$0xf] }
 0x14d   : > { %v410_v59 = vsel %vm409_vm1, %v406_v54, %v408_v58  ;;  %v413_v60 = vsel %vm409_vm1, %v408_v58, %v402_v52  ;;  %v3258_v52 = vld [vmem:[%s4735_s2 + $0x8] sm:$0xff] }
 0x14e   : > { %v419_v61 = vcombine.low %v410_v59, %v413_v60  ;;  %v422_v62 = vmax.f32 %v393_v47, %v418_v57 }
 0x150   : > { %v426_v63 = vcombine.high %v422_v62, %v422_v62  ;;  %v423_v0 = vmax.f32 %v394_v50, %v419_v61  ;;  %v430_v3 = vpack.c.bf16 %v422_v62, %v422_v62  ;;  %v4264_v61 = vsel %vm778_vm9, 1.0, %v3970_v6 }
 0x151   : > { %v4267_v62 = vsel %vm781_vm10, 1.0, %v3970_v6  ;;  %vm2850_vm9 = vcmp.lt.s32.totalorder %v4167_v26, 16 }
 0x152   : > { %v431_v1 = vpack.c.bf16 %v426_v63, %v426_v63  ;;  %v427_v2 = vcombine.high %v423_v0, %v423_v0  ;;  %v432_v5 = vpack.c.bf16 %v423_v0, %v423_v0 }
 0x154   : > { %722 = vmatprep.mubr.bf16.mxu0 %v431_v1  ;;  %v433_v4 = vpack.c.bf16 %v427_v2, %v427_v2 }
 0x155   : > { %723 = vmatmul.mubr.bf16.vlgmr.msra.gmra.mrb[0].mxu0 %v430_v3 }
 0x156   : > { %762 = vmatprep.mubr.bf16.mxu1 %v433_v4  ;;  %3499 = vmatprep.mubr.msk.bf16.mxu0 %vm3971_vm2, %v3970_v6 }
 0x157   : > { %763 = vmatmul.mubr.bf16.vlgmr.msra.gmra.mrb[0].mxu1 %v432_v5 }
 0x158   : > { %3507 = vmatprep.mubr.msk.bf16.mxu1 %vm3971_vm2, %v3970_v6 }
 0x15b   : > { %v790_v24 = vpop.permute.xlu0 %789 }
 0x15f   : > { %v999_v60 = vpop.permute.xlu0 %998 }
 0x228   : > { %v3404_v10 = vpop.f32.mrb[0].mxu0 }
 0x229   : > { %v3405_v11 = vpop.f32.mrb[1].mxu0 }
 0x22a   : > { %v3406_v12 = vadd.f32 %v3405_v11, %v3404_v10  ;;  %v3407_v13 = vpop.f32.mrb[2].mxu0  ;;  %v3426_v14 = vpop.f32.mrb[0].mxu1  ;;  %v1003_v11 = vld [vmem:[%s4738_s5] sm:$0x3] }
 0x22b   : > { %v3408_v15 = vpop.f32.mrb[3].mxu0  ;;  %v3427_v16 = vpop.f32.mrb[1].mxu1 }
 0x22c   : > { %v3428_v17 = vadd.f32 %v3427_v16, %v3426_v14  ;;  %v3429_v18 = vpop.f32.mrb[2].mxu1 }
 0x22d   : > { %v3430_v19 = vpop.f32.mrb[3].mxu1 }
 0x22e   : > { %v4207_v20 = vadd.f32 %v3428_v17, %v3406_v12 }
 0x230   : > { %v785_v21 = vpack.c.bf16 %v4207_v20, %v4207_v20 }
 0x232   : > { %v798_v22 = vsel %vm796_vm3, %v785_v21, 0 }
 0x233   : > { %3498 = vmatpush3.bf16.msra.mxu0 %v798_v22 }
 0x234   : > { %3511 = vmatprep.subr.bf16.mxu0 %v3970_v6 }
 0x236   : > { %3500 = vmatmul.mubr.msk.bf16.vlgmr.msra.gmra.mrb[4].mxu0 %vm792_vm4, %v784_v23  ;;  %v3257_v23 = vld [vmem:[%s4734_s1 + $0x4] sm:$0xf] }
 0x237   : > { %3515 = vmatprep.mubr.msk.bf16.mxu0 %vm3971_vm2, %v3970_v6 }
 0x309   : > { %v834_v25 = vpop.f32.mrb[4].mxu0 }
 0x30a   : > { %v835_v27 = vadd.f32 %v834_v25, %v790_v24  ;;  %v3501_v28 = vpop.f32.mrb[5].mxu0 }
 0x30b   : > { %v837_v29 = vpop.f32.mrb[6].mxu0 }
 0x30c   : > { %v840_v30 = vmax.f32 %v835_v27, 0.0  ;;  %v3502_v31 = vpop.f32.mrb[7].mxu0 }
 0x30d   : > { %v3266_v31 = vld [vmem:[%s4737_s4 + $0x8] sm:$0xff] }
 0x30e   : > { %841 = vrot.lane.b32.xlu1 %v840_v30, %s3973_s18 }
 0x312   : > { %844 = vrot.lane.b32.xlu1 %v840_v30, %s3968_s14 }
 0x380   : > { %v842_v35 = vpop.permute.xlu1 %841 }
 0x381   : > { %v843_v36 = vmul.f32 %v4223_v34, %v842_v35 }
 0x383   : > { %v847_v38 = vpack.c.bf16 %v840_v30, %v843_v36 }
 0x384   : > { %v845_v39 = vpop.permute.xlu1 %844 }
 0x385   : > { %v846_v40 = vmul.f32 %v4227_v37, %v845_v39  ;;  %3504 = vmatpush3.bf16.msra.mxu1 %v847_v38  ;;  %3512 = vmatpush3.bf16.msra.mxu0 %v847_v38 }
 0x386   : > { %3505 = vmatprep.subr.bf16.mxu1 %v3970_v6  ;;  %3513 = vmatprep.subr.bf16.mxu0 %v3970_v6 }
 0x387   : > { %v848_v41 = vpack.c.bf16 %v846_v40, %v846_v40 }
 0x389   : > { %v856_v42 = vsel %vm854_vm7, %v848_v41, 0 }
 0x38a   : > { %3506 = vmatpush3.bf16.msra.mxu1 %v856_v42  ;;  %3514 = vmatpush3.bf16.msra.mxu0 %v856_v42 }
 0x38b   : > { %3519 = vmatprep.subr.bf16.mxu1 %v3970_v6  ;;  %3527 = vmatprep.subr.bf16.mxu0 %v3970_v6 }
 0x38d   : > { %3508 = vmatmul.mubr.msk.bf16.vlgmr.msra.gmra.mrb[4].mxu1 %vm850_vm8, %v849_v43  ;;  %3516 = vmatmul.mubr.msk.bf16.vlgmr.msra.gmra.mrb[8].mxu0 %vm850_vm8, %v3253_v44  ;;  %v3263_v43 = vld [vmem:[%s4736_s3 + $0x14] sm:$0xf]  ;;  %v3262_v44 = vld [vmem:[%s4736_s3 + $0x10] sm:$0xf] }
 0x38e   : > { %3520 = vmatpush3.bf16.msra.mxu1 %v847_v38  ;;  %3523 = vmatprep.mubr.msk.bf16.mxu1 %vm3971_vm2, %v3970_v6 }
 0x38f   : > { %3521 = vmatprep.subr.bf16.mxu1 %v3970_v6  ;;  %3529 = vmatprep.mubr.msk.bf16.mxu0 %vm3971_vm2, %v3970_v6 }
 0x392   : > { %3522 = vmatpush3.bf16.msra.mxu1 %v856_v42  ;;  %v3260_v42 = vld [vmem:[%s4736_s3 + $0xc] sm:$0xf] }
 0x393   : > { %3533 = vmatprep.subr.bf16.mxu1 %v3970_v6 }
 0x395   : > { %3524 = vmatmul.mubr.msk.bf16.vlgmr.msra.gmra.mrb[8].mxu1 %vm850_vm8, %v3252_v45  ;;  %v3270_v45 = vld [vmem:[%s4734_s1 + $0x8] sm:$0xf] }
 0x396   : > { %3535 = vmatprep.mubr.msk.bf16.mxu1 %vm3971_vm2, %v3970_v6 }
 0x460   : > { %v892_v46 = vpop.f32.mrb[4].mxu1  ;;  %v939_v47 = vpop.f32.mrb[8].mxu0 }
 0x461   : > { %945 = vrot.lane.b32.xlu1 %v892_v46, %s3974_s17  ;;  %v3509_v48 = vpop.f32.mrb[5].mxu1  ;;  %991 = vrot.lane.b32.xlu0 %v939_v47, %s3975_s22  ;;  %v3517_v49 = vpop.f32.mrb[9].mxu0 }
 0x462   : > { %v895_v50 = vpop.f32.mrb[6].mxu1  ;;  %v942_v51 = vpop.f32.mrb[10].mxu0 }
 0x463   : > { %v3510_v53 = vpop.f32.mrb[7].mxu1  ;;  %v3518_v54 = vpop.f32.mrb[11].mxu0 }
 0x465   : > { %1067 = vperm.xlu0 %3750, %v3258_v52   ;;  %1008 = vperm.xlu1 %3751, %v1005_v55  }
 0x468   : > { %v985_v56 = vpop.f32.mrb[8].mxu1 }
 0x469   : > { %v3525_v57 = vpop.f32.mrb[9].mxu1 }
 0x46a   : > { %v988_v58 = vpop.f32.mrb[10].mxu1 }
 0x46b   : > { %v3526_v59 = vpop.f32.mrb[11].mxu1 }
 0x4d3   : > { %v946_v63 = vpop.permute.xlu1 %945  ;;  %v992_v0 = vpop.permute.xlu0 %991 }
 0x4d4   : > { %v947_v1 = vmul.f32 %v4264_v61, %v946_v63  ;;  %v993_v2 = vmul.f32 %v4267_v62, %v992_v0 }
 0x4d6   : > { %v986_v3 = vadd.f32 %v985_v56, %v947_v1 }
 0x4d8   : > { %v994_v4 = vadd.f32 %v993_v2, %v986_v3  ;;  %v3279_v3 = vld [vmem:[%s4737_s4 + $0x10] sm:$0xff] }
 0x4da   : > { %v1001_v5 = vadd.f32 %v999_v60, %v994_v4 }
 0x4dc   : > { %v1002_v7 = vmax.f32 %v1001_v5, 0.0 }
 0x4de   : > { %v1004_v9 = vpack.c.bf16 %v1002_v7, %v1002_v7 }
 0x4e0   : > { %v1016_v10 = vsel %vm854_vm7, %v1004_v9, 0 }
 0x4e1   : > { %3528 = vmatpush3.bf16.msra.mxu0 %v1016_v10 }
 0x4e2   : > { %3539 = vmatprep.subr.bf16.mxu0 %v3970_v6 }
 0x4e4   : > { %3530 = vmatmul.mubr.msk.bf16.vlgmr.msra.gmra.mrb[12].mxu0 %vm1011_vm11, %v1003_v11  ;;  %v1009_v12 = vpop.permute.xlu1 %1008 }
 0x4e5   : > { %3543 = vmatprep.mubr.msk.bf16.mxu0 %vm3971_vm2, %v3970_v6 }
 0x5b7   : > { %v1052_v13 = vpop.f32.mrb[12].mxu0 }
 0x5b8   : > { %v1053_v14 = vadd.f32 %v1052_v13, %v1009_v12  ;;  %v3531_v15 = vpop.f32.mrb[13].mxu0 }
 0x5b9   : > { %v1055_v16 = vpop.f32.mrb[14].mxu0 }
 0x5ba   : > { %v1058_v17 = vadd.f32 %v1053_v14, %v4207_v20  ;;  %v3532_v18 = vpop.f32.mrb[15].mxu0  ;;  %v1068_v20 = vpop.permute.xlu0 %1067 }
 0x5bc   : > { %v4280_v19 = vmax.f32 %v1058_v17, 0.0  ;;  %v3267_v17 = vld [vmem:[%s4738_s5 + $0x2] sm:$0x3] }
 0x5be   : > { %v1062_v21 = vpack.c.bf16 %v4280_v19, %v4280_v19 }
 0x5c0   : > { %v1074_v22 = vsel %vm796_vm3, %v1062_v21, 0 }
 0x5c1   : > { %3534 = vmatpush3.bf16.msra.mxu1 %v1074_v22 }
 0x5c2   : > { %3547 = vmatprep.subr.bf16.mxu1 %v3970_v6 }
 0x5c4   : > { %3536 = vmatmul.mubr.msk.bf16.vlgmr.msra.gmra.mrb[12].mxu1 %vm792_vm4, %v3257_v23 }
 0x5c5   : > { %3551 = vmatprep.mubr.msk.bf16.mxu1 %vm3971_vm2, %v3970_v6 }
 0x697   : > { %v1110_v24 = vpop.f32.mrb[12].mxu1 }
 0x698   : > { %v1111_v25 = vadd.f32 %v1110_v24, %v1068_v20  ;;  %v3537_v27 = vpop.f32.mrb[13].mxu1 }
 0x699   : > { %v1113_v28 = vpop.f32.mrb[14].mxu1  ;;  %v3273_v27 = vld [vmem:[%s4736_s3 + $0x18] sm:$0xf] }
 0x69a   : > { %v1116_v29 = vmax.f32 %v1111_v25, 0.0  ;;  %v3538_v30 = vpop.f32.mrb[15].mxu1  ;;  %v3276_v28 = vld [vmem:[%s4736_s3 + $0x20] sm:$0xf] }
 0x69c   : > { %1120 = vrot.lane.b32.xlu0 %v1116_v29, %s3968_s14  ;;  %1117 = vrot.lane.b32.xlu1 %v1116_v29, %s3973_s18 }
 0x6a0   : > { %1274 = vperm.xlu0 %3750, %v3266_v31   ;;  %1343 = vperm.xlu1 %3751, %v3271_v32  }
 0x70e   : > { %v1121_v33 = vpop.permute.xlu0 %1120  ;;  %v1118_v35 = vpop.permute.xlu1 %1117 }
 0x70f   : > { %v1122_v36 = vmul.f32 %v4227_v37, %v1121_v33  ;;  %v1119_v38 = vmul.f32 %v4223_v34, %v1118_v35 }
 0x711   : > { %v1123_v39 = vpack.c.bf16 %v1116_v29, %v1119_v38  ;;  %v1124_v40 = vpack.c.bf16 %v1122_v36, %v1122_v36  ;;  %v3275_v29 = vld [vmem:[%s4736_s3 + $0x1c] sm:$0xf] }
 0x713   : > { %3540 = vmatpush3.bf16.msra.mxu0 %v1123_v39  ;;  %3548 = vmatpush3.bf16.msra.mxu1 %v1123_v39  ;;  %v1131_v41 = vsel %vm854_vm7, %v1124_v40, 0 }
 0x714   : > { %3541 = vmatprep.subr.bf16.mxu0 %v3970_v6  ;;  %3549 = vmatprep.subr.bf16.mxu1 %v3970_v6 }
 0x717   : > { %3542 = vmatpush3.bf16.msra.mxu0 %v1131_v41  ;;  %3550 = vmatpush3.bf16.msra.mxu1 %v1131_v41 }
 0x718   : > { %3555 = vmatprep.subr.bf16.mxu0 %v3970_v6  ;;  %3563 = vmatprep.subr.bf16.mxu1 %v3970_v6 }
 0x71a   : > { %3544 = vmatmul.mubr.msk.bf16.vlgmr.msra.gmra.mrb[16].mxu0 %vm850_vm8, %v3260_v42  ;;  %3552 = vmatmul.mubr.msk.bf16.vlgmr.msra.gmra.mrb[16].mxu1 %vm850_vm8, %v3263_v43  ;;  %v3281_v42 = vld [vmem:[%s4739_s6 + $0x8] sm:$0xf]  ;;  %v3284_v43 = vld [vmem:[%s4735_s2 + $0x18] sm:$0xff] }
 0x71b   : > { %3556 = vmatpush3.bf16.msra.mxu0 %v1123_v39  ;;  %3559 = vmatprep.mubr.msk.bf16.mxu0 %vm3971_vm2, %v3970_v6 }
 0x71c   : > { %3557 = vmatprep.subr.bf16.mxu0 %v3970_v6  ;;  %3565 = vmatprep.mubr.msk.bf16.mxu1 %vm3971_vm2, %v3970_v6 }
 0x71f   : > { %3558 = vmatpush3.bf16.msra.mxu0 %v1131_v41  ;;  %v1344_v58 = vpop.permute.xlu1 %1343  ;;  %v1275_v4 = vpop.permute.xlu0 %1274 }
 0x720   : > { %3569 = vmatprep.subr.bf16.mxu0 %v3970_v6 }
 0x722   : > { %3560 = vmatmul.mubr.msk.bf16.vlgmr.msra.gmra.mrb[20].mxu0 %vm850_vm8, %v3262_v44 }
 0x723   : > { %3570 = vmatpush3.bf16.msra.mxu0 %v1074_v22  ;;  %3571 = vmatprep.mubr.msk.bf16.mxu0 %vm3971_vm2, %v3970_v6 }
 0x724   : > { %3583 = vmatprep.subr.bf16.mxu0 %v3970_v6 }
 0x72a   : > { %3572 = vmatmul.mubr.msk.bf16.vlgmr.msra.gmra.mrb[24].mxu0 %vm792_vm4, %v3270_v45 }
 0x72b   : > { %3587 = vmatprep.mubr.msk.bf16.mxu0 %vm3971_vm2, %v3970_v6 }
 0x7ed   : > { %v1167_v46 = vpop.f32.mrb[16].mxu0  ;;  %v1214_v47 = vpop.f32.mrb[16].mxu1 }
 0x7ee   : > { %1220 = vrot.lane.b32.xlu1 %v1167_v46, %s3974_s17  ;;  %v3545_v48 = vpop.f32.mrb[17].mxu0  ;;  %1266 = vrot.lane.b32.xlu0 %v1214_v47, %s3975_s22  ;;  %v3553_v49 = vpop.f32.mrb[17].mxu1 }
 0x7ef   : > { %v1170_v50 = vpop.f32.mrb[18].mxu0  ;;  %v1217_v51 = vpop.f32.mrb[18].mxu1 }
 0x7f0   : > { %v3546_v52 = vpop.f32.mrb[19].mxu0  ;;  %v3554_v53 = vpop.f32.mrb[19].mxu1 }
 0x7f5   : > { %v1260_v54 = vpop.f32.mrb[20].mxu0 }
 0x7f6   : > { %v3561_v55 = vpop.f32.mrb[21].mxu0 }
 0x7f7   : > { %v1263_v56 = vpop.f32.mrb[22].mxu0 }
 0x7f8   : > { %v3562_v57 = vpop.f32.mrb[23].mxu0 }
 0x7fd   : > { %v1383_v59 = vpop.f32.mrb[24].mxu0 }
 0x7fe   : > { %v1384_v60 = vadd.f32 %v1383_v59, %v1344_v58  ;;  %v3573_v63 = vpop.f32.mrb[25].mxu0 }
 0x7ff   : > { %v1386_v0 = vpop.f32.mrb[26].mxu0  ;;  %v3280_v63 = vld [vmem:[%s4738_s5 + $0x4] sm:$0x3] }
 0x800   : > { %v1389_v1 = vmax.f32 %v1384_v60, 0.0  ;;  %v3574_v2 = vpop.f32.mrb[27].mxu0 }
 0x802   : > { %1393 = vrot.lane.b32.xlu0 %v1389_v1, %s3968_s14  ;;  %1390 = vrot.lane.b32.xlu1 %v1389_v1, %s3973_s18 }
 0x806   : > { %1547 = vperm.xlu1 %3751, %v3279_v3  }
 0x860   : > { %v1221_v5 = vpop.permute.xlu1 %1220  ;;  %v1267_v7 = vpop.permute.xlu0 %1266 }
 0x861   : > { %v1222_v9 = vmul.f32 %v4264_v61, %v1221_v5  ;;  %v1268_v10 = vmul.f32 %v4267_v62, %v1267_v7 }
 0x863   : > { %v1261_v11 = vadd.f32 %v1260_v54, %v1222_v9 }
 0x865   : > { %v1269_v12 = vadd.f32 %v1268_v10, %v1261_v11 }
 0x867   : > { %v1277_v13 = vadd.f32 %v1275_v4, %v1269_v12  ;;  %v3283_v12 = vld [vmem:[%s4734_s1 + $0xc] sm:$0xf] }
 0x869   : > { %v1278_v14 = vmax.f32 %v1277_v13, 0.0 }
 0x86b   : > { %v1281_v15 = vpack.c.bf16 %v1278_v14, %v1278_v14 }
 0x86d   : > { %v1293_v16 = vsel %vm854_vm7, %v1281_v15, 0 }
 0x86e   : > { %3564 = vmatpush3.bf16.msra.mxu1 %v1293_v16 }
 0x86f   : > { %3575 = vmatprep.subr.bf16.mxu1 %v3970_v6 }
 0x871   : > { %3566 = vmatmul.mubr.msk.bf16.vlgmr.msra.gmra.mrb[20].mxu1 %vm1011_vm11, %v3267_v17 }
 0x872   : > { %3579 = vmatprep.mubr.msk.bf16.mxu1 %vm3971_vm2, %v3970_v6 }
 0x874   : > { %v1394_v18 = vpop.permute.xlu0 %1393  ;;  %v1391_v21 = vpop.permute.xlu1 %1390 }
 0x875   : > { %v1395_v22 = vmul.f32 %v4227_v37, %v1394_v18  ;;  %v1392_v23 = vmul.f32 %v4223_v34, %v1391_v21 }
 0x877   : > { %v1396_v20 = vpack.c.bf16 %v1389_v1, %v1392_v23  ;;  %v1397_v24 = vpack.c.bf16 %v1395_v22, %v1395_v22  ;;  %v3292_v22 = vld [vmem:[%s4737_s4 + $0x18] sm:$0xff] }
 0x879   : > { %3576 = vmatpush3.bf16.msra.mxu1 %v1396_v20  ;;  %3584 = vmatpush3.bf16.msra.mxu0 %v1396_v20  ;;  %v1404_v25 = vsel %vm854_vm7, %v1397_v24, 0 }
 0x87a   : > { %3577 = vmatprep.subr.bf16.mxu1 %v3970_v6  ;;  %3585 = vmatprep.subr.bf16.mxu0 %v3970_v6 }
 0x87d   : > { %3578 = vmatpush3.bf16.msra.mxu1 %v1404_v25  ;;  %3586 = vmatpush3.bf16.msra.mxu0 %v1404_v25 }
 0x87e   : > { %3591 = vmatprep.subr.bf16.mxu1 %v3970_v6  ;;  %3599 = vmatprep.subr.bf16.mxu0 %v3970_v6 }
 0x880   : > { %3580 = vmatmul.mubr.msk.bf16.vlgmr.msra.gmra.mrb[24].mxu1 %vm850_vm8, %v3273_v27  ;;  %3588 = vmatmul.mubr.msk.bf16.vlgmr.msra.gmra.mrb[28].mxu0 %vm850_vm8, %v3276_v28 }
 0x881   : > { %3592 = vmatpush3.bf16.msra.mxu1 %v1396_v20  ;;  %3595 = vmatprep.mubr.msk.bf16.mxu1 %vm3971_vm2, %v3970_v6 }
 0x882   : > { %3593 = vmatprep.subr.bf16.mxu1 %v3970_v6  ;;  %3601 = vmatprep.mubr.msk.bf16.mxu0 %vm3971_vm2, %v3970_v6 }
 0x885   : > { %3594 = vmatpush3.bf16.msra.mxu1 %v1404_v25  ;;  %v1548_v50 = vpop.permute.xlu1 %1547 }
 0x886   : > { %3605 = vmatprep.subr.bf16.mxu1 %v3970_v6 }
 0x888   : > { %3596 = vmatmul.mubr.msk.bf16.vlgmr.msra.gmra.mrb[28].mxu1 %vm850_vm8, %v3275_v29 }
 0x889   : > { %3607 = vmatprep.mubr.msk.bf16.mxu1 %vm3971_vm2, %v3970_v6 }
 0x944   : > { %v4378_v30 = vpop.f32.mrb[20].mxu1 }
 0x945   : > { %v3567_v31 = vpop.f32.mrb[21].mxu1 }
 0x946   : > { %v1332_v32 = vpop.f32.mrb[22].mxu1  ;;  %v3286_v31 = vld [vmem:[%s4736_s3 + $0x24] sm:$0xf] }
 0x947   : > { %v3568_v33 = vpop.f32.mrb[23].mxu1  ;;  %v3289_v32 = vld [vmem:[%s4736_s3 + $0x2c] sm:$0xf] }
 0x948   : > { %v3288_v33 = vld [vmem:[%s4736_s3 + $0x28] sm:$0xf] }
 0x953   : > { %v1440_v35 = vpop.f32.mrb[24].mxu1  ;;  %v1487_v36 = vpop.f32.mrb[28].mxu0 }
 0x954   : > { %1493 = vrot.lane.b32.xlu0 %v1440_v35, %s3974_s17  ;;  %v3581_v38 = vpop.f32.mrb[25].mxu1  ;;  %1539 = vrot.lane.b32.xlu1 %v1487_v36, %s3975_s22  ;;  %v3589_v39 = vpop.f32.mrb[29].mxu0 }
 0x955   : > { %v1443_v40 = vpop.f32.mrb[26].mxu1  ;;  %v1490_v41 = vpop.f32.mrb[30].mxu0 }
 0x956   : > { %v3582_v44 = vpop.f32.mrb[27].mxu1  ;;  %v3590_v45 = vpop.f32.mrb[31].mxu0 }
 0x958   : > { %1559 = vperm.xlu0 %3750, %v3281_v42   ;;  %1617 = vperm.xlu1 %3751, %v3284_v43   ;;  %v3297_v42 = vld [vmem:[%s4735_s2 + $0x20] sm:$0xff]  ;;  %v3294_v43 = vld [vmem:[%s4739_s6 + $0xc] sm:$0xf] }
 0x95b   : > { %v1533_v46 = vpop.f32.mrb[28].mxu1 }
 0x95c   : > { %v3597_v47 = vpop.f32.mrb[29].mxu1 }
 0x95d   : > { %v1536_v48 = vpop.f32.mrb[30].mxu1 }
 0x95e   : > { %v3598_v49 = vpop.f32.mrb[31].mxu1 }
 0x9c6   : > { %v1494_v51 = vpop.permute.xlu0 %1493  ;;  %v1540_v52 = vpop.permute.xlu1 %1539 }
 0x9c7   : > { %v1495_v53 = vmul.f32 %v4264_v61, %v1494_v51  ;;  %v1541_v54 = vmul.f32 %v4267_v62, %v1540_v52 }
 0x9c9   : > { %v1534_v55 = vadd.f32 %v1533_v46, %v1495_v53 }
 0x9cb   : > { %v1542_v56 = vadd.f32 %v1541_v54, %v1534_v55 }
 0x9cd   : > { %v1550_v57 = vadd.f32 %v1548_v50, %v1542_v56 }
 0x9cf   : > { %v1551_v58 = vmax.f32 %v1550_v57, 0.0 }
 0x9d1   : > { %v1554_v59 = vpack.c.bf16 %v1551_v58, %v1551_v58 }
 0x9d3   : > { %v1566_v60 = vsel %vm854_vm7, %v1554_v59, 0 }
 0x9d4   : > { %3600 = vmatpush3.bf16.msra.mxu0 %v1566_v60 }
 0x9d5   : > { %3611 = vmatprep.subr.bf16.mxu0 %v3970_v6 }
 0x9d7   : > { %3602 = vmatmul.mubr.msk.bf16.vlgmr.msra.gmra.mrb[32].mxu0 %vm1011_vm11, %v3280_v63  ;;  %v1560_v0 = vpop.permute.xlu0 %1559  ;;  %v1618_v13 = vpop.permute.xlu1 %1617  ;;  %v3293_v63 = vld [vmem:[%s4738_s5 + $0x6] sm:$0x3] }
 0x9d8   : > { %3615 = vmatprep.mubr.msk.bf16.mxu0 %vm3971_vm2, %v3970_v6 }
 0xaaa   : > { %v1602_v1 = vpop.f32.mrb[32].mxu0 }
 0xaab   : > { %v1603_v2 = vadd.f32 %v1602_v1, %v1560_v0  ;;  %v3603_v3 = vpop.f32.mrb[33].mxu0 }
 0xaac   : > { %v1605_v4 = vpop.f32.mrb[34].mxu0 }
 0xaad   : > { %v1608_v5 = vadd.f32 %v1603_v2, %v4280_v19  ;;  %v3604_v7 = vpop.f32.mrb[35].mxu0 }
 0xaaf   : > { %v4399_v9 = vmax.f32 %v1608_v5, 0.0 }
 0xab1   : > { %v1612_v10 = vpack.c.bf16 %v4399_v9, %v4399_v9 }
 0xab3   : > { %v1624_v11 = vsel %vm796_vm3, %v1612_v10, 0 }
 0xab4   : > { %3606 = vmatpush3.bf16.msra.mxu1 %v1624_v11 }
 0xab5   : > { %3619 = vmatprep.subr.bf16.mxu1 %v3970_v6 }
 0xab7   : > { %3608 = vmatmul.mubr.msk.bf16.vlgmr.msra.gmra.mrb[32].mxu1 %vm792_vm4, %v3283_v12 }
 0xab8   : > { %3623 = vmatprep.mubr.msk.bf16.mxu1 %vm3971_vm2, %v3970_v6 }
 0xb8a   : > { %v1660_v14 = vpop.f32.mrb[32].mxu1 }
 0xb8b   : > { %v1661_v15 = vadd.f32 %v1660_v14, %v1618_v13  ;;  %v3609_v16 = vpop.f32.mrb[33].mxu1  ;;  %v3296_v13 = vld [vmem:[%s4734_s1 + $0x10] sm:$0xf] }
 0xb8c   : > { %v1663_v17 = vpop.f32.mrb[34].mxu1 }
 0xb8d   : > { %v1666_v18 = vmax.f32 %v1661_v15, 0.0  ;;  %v3610_v21 = vpop.f32.mrb[35].mxu1 }
 0xb8f   : > { %1670 = vrot.lane.b32.xlu1 %v1666_v18, %s3968_s14  ;;  %1667 = vrot.lane.b32.xlu0 %v1666_v18, %s3973_s18 }
 0xb93   : > { %1824 = vperm.xlu0 %3750, %v3292_v22   ;;  %v3305_v22 = vld [vmem:[%s4737_s4 + $0x20] sm:$0xff] }
 0xc01   : > { %v1671_v23 = vpop.permute.xlu1 %1670  ;;  %v1668_v20 = vpop.permute.xlu0 %1667 }
 0xc02   : > { %v1672_v24 = vmul.f32 %v4227_v37, %v1671_v23  ;;  %v1669_v25 = vmul.f32 %v4223_v34, %v1668_v20 }
 0xc04   : > { %v1673_v27 = vpack.c.bf16 %v1666_v18, %v1669_v25  ;;  %v1674_v28 = vpack.c.bf16 %v1672_v24, %v1672_v24 }
 0xc06   : > { %3612 = vmatpush3.bf16.msra.mxu0 %v1673_v27  ;;  %3620 = vmatpush3.bf16.msra.mxu1 %v1673_v27  ;;  %v1681_v29 = vsel %vm854_vm7, %v1674_v28, 0 }
 0xc07   : > { %3613 = vmatprep.subr.bf16.mxu0 %v3970_v6  ;;  %3621 = vmatprep.subr.bf16.mxu1 %v3970_v6 }
 0xc0a   : > { %3614 = vmatpush3.bf16.msra.mxu0 %v1681_v29  ;;  %3622 = vmatpush3.bf16.msra.mxu1 %v1681_v29 }
 0xc0b   : > { %3627 = vmatprep.subr.bf16.mxu0 %v3970_v6  ;;  %3635 = vmatprep.subr.bf16.mxu1 %v3970_v6 }
 0xc0d   : > { %3616 = vmatmul.mubr.msk.bf16.vlgmr.msra.gmra.mrb[36].mxu0 %vm850_vm8, %v3286_v31  ;;  %3624 = vmatmul.mubr.msk.bf16.vlgmr.msra.gmra.mrb[36].mxu1 %vm850_vm8, %v3289_v32  ;;  %v3299_v31 = vld [vmem:[%s4736_s3 + $0x30] sm:$0xf] }
 0xc0e   : > { %3628 = vmatpush3.bf16.msra.mxu0 %v1673_v27  ;;  %3631 = vmatprep.mubr.msk.bf16.mxu0 %vm3971_vm2, %v3970_v6 }
 0xc0f   : > { %3629 = vmatprep.subr.bf16.mxu0 %v3970_v6  ;;  %3637 = vmatprep.mubr.msk.bf16.mxu1 %vm3971_vm2, %v3970_v6 }
 0xc12   : > { %3630 = vmatpush3.bf16.msra.mxu0 %v1681_v29  ;;  %v1825_v50 = vpop.permute.xlu0 %1824 }
 0xc13   : > { %3641 = vmatprep.subr.bf16.mxu0 %v3970_v6 }
 0xc15   : > { %3632 = vmatmul.mubr.msk.bf16.vlgmr.msra.gmra.mrb[40].mxu0 %vm850_vm8, %v3288_v33 }
 0xc16   : > { %3643 = vmatprep.mubr.msk.bf16.mxu0 %vm3971_vm2, %v3970_v6 }
 0xce0   : > { %v1717_v35 = vpop.f32.mrb[36].mxu0  ;;  %v1764_v36 = vpop.f32.mrb[36].mxu1 }
 0xce1   : > { %1816 = vrot.lane.b32.xlu0 %v1764_v36, %s3975_s22  ;;  %v3625_v38 = vpop.f32.mrb[37].mxu1  ;;  %1770 = vrot.lane.b32.xlu1 %v1717_v35, %s3974_s17  ;;  %v3617_v39 = vpop.f32.mrb[37].mxu0 }
 0xce2   : > { %v1720_v40 = vpop.f32.mrb[38].mxu0  ;;  %v1767_v41 = vpop.f32.mrb[38].mxu1 }
 0xce3   : > { %v3618_v44 = vpop.f32.mrb[39].mxu0  ;;  %v3626_v45 = vpop.f32.mrb[39].mxu1  ;;  %v3268_v40 = vld [vmem:[%s4739_s6 + $0x4] sm:$0xf]  ;;  %v3307_v41 = vld [vmem:[%s4739_s6 + $0x10] sm:$0xf] }
 0xce4   : > { %v3354_v44 = vld [vmem:[%s4735_s2 + $0x28] sm:$0xff] }
 0xce5   : > { %1894 = vperm.xlu0 %3750, %v3297_v42   ;;  %1836 = vperm.xlu1 %3751, %v3294_v43  }
 0xce8   : > { %v1810_v46 = vpop.f32.mrb[40].mxu0 }
 0xce9   : > { %v3633_v47 = vpop.f32.mrb[41].mxu0 }
 0xcea   : > { %v1813_v48 = vpop.f32.mrb[42].mxu0  ;;  %v3786_v47 = vld [vmem:[#allocation5] ss:$16 sps:$4 sm:$0xff]  }
 0xceb   : > { %v3634_v49 = vpop.f32.mrb[43].mxu0  ;;  %v3788_v48 = vld [vmem:[#allocation5 + $0x4] ss:$16 sps:$4 sm:$0xff]  }
 0xd53   : > { %v1771_v51 = vpop.permute.xlu1 %1770  ;;  %v1817_v52 = vpop.permute.xlu0 %1816 }
 0xd54   : > { %v1772_v53 = vmul.f32 %v4264_v61, %v1771_v51  ;;  %v1818_v54 = vmul.f32 %v4267_v62, %v1817_v52  ;;  %v3794_v51 = vld [vmem:[#allocation5 + $0x24] ss:$16 sps:$4 sm:$0xff]   ;;  %v3792_v52 = vld [vmem:[#allocation5 + $0x20] ss:$16 sps:$4 sm:$0xff]  }
 0xd56   : > { %v1811_v55 = vadd.f32 %v1810_v46, %v1772_v53  ;;  %v3800_v53 = vld [vmem:[#allocation5 + $0x44] ss:$16 sps:$4 sm:$0xff]  }
 0xd58   : > { %v1819_v56 = vadd.f32 %v1818_v54, %v1811_v55  ;;  %v3798_v54 = vld [vmem:[#allocation5 + $0x40] ss:$16 sps:$4 sm:$0xff]   ;;  %v3806_v55 = vld [vmem:[#allocation5 + $0x64] ss:$16 sps:$4 sm:$0xff]  }
 0xd5a   : > { %v1827_v57 = vadd.f32 %v1825_v50, %v1819_v56  ;;  %v3804_v56 = vld [vmem:[#allocation5 + $0x60] ss:$16 sps:$4 sm:$0xff]  }
 0xd5c   : > { %v1828_v58 = vmax.f32 %v1827_v57, 0.0  ;;  %v3812_v57 = vld [vmem:[#allocation5 + $0x84] ss:$16 sps:$4 sm:$0xff]  }
 0xd5e   : > { %v1831_v59 = vpack.c.bf16 %v1828_v58, %v1828_v58  ;;  %v3810_v58 = vld [vmem:[#allocation5 + $0x80] ss:$16 sps:$4 sm:$0xff]  }
 0xd60   : > { %v1843_v60 = vsel %vm854_vm7, %v1831_v59, 0  ;;  %v3818_v59 = vld [vmem:[#allocation5 + $0xa4] ss:$16 sps:$4 sm:$0xff]  }
 0xd61   : > { %3636 = vmatpush3.bf16.msra.mxu1 %v1843_v60  ;;  %v3816_v60 = vld [vmem:[#allocation5 + $0xa0] ss:$16 sps:$4 sm:$0xff]  }
 0xd62   : > { %3647 = vmatprep.subr.bf16.mxu1 %v3970_v6 }
 0xd64   : > { %3638 = vmatmul.mubr.msk.bf16.vlgmr.msra.gmra.mrb[40].mxu1 %vm1011_vm11, %v3293_v63  ;;  %v1837_v0 = vpop.permute.xlu1 %1836 }
 0xd65   : > { %3651 = vmatprep.mubr.msk.bf16.mxu1 %vm3971_vm2, %v3970_v6 }
 0xe37   : > { %v1879_v1 = vpop.f32.mrb[40].mxu1 }
 0xe38   : > { %v1880_v2 = vadd.f32 %v1879_v1, %v1837_v0  ;;  %v3639_v3 = vpop.f32.mrb[41].mxu1 }
 0xe39   : > { %v1882_v4 = vpop.f32.mrb[42].mxu1 }
 0xe3a   : > { %v1885_v5 = vadd.f32 %v1880_v2, %v4399_v9  ;;  %v3640_v7 = vpop.f32.mrb[43].mxu1  ;;  %v1895_v9 = vpop.permute.xlu0 %1894 }
 0xe3c   : > { %v4462_v10 = vmax.f32 %v1885_v5, 0.0 }
 0xe3e   : > { %v1889_v11 = vpack.c.bf16 %v4462_v10, %v4462_v10 }
 0xe40   : > { %v1901_v12 = vsel %vm796_vm3, %v1889_v11, 0 }
 0xe41   : > { %3642 = vmatpush3.bf16.msra.mxu0 %v1901_v12 }
 0xe42   : > { %3655 = vmatprep.subr.bf16.mxu0 %v3970_v6 }
 0xe44   : > { %3644 = vmatmul.mubr.msk.bf16.vlgmr.msra.gmra.mrb[44].mxu0 %vm792_vm4, %v3296_v13  ;;  %v3791_v13 = vld [vmem:[#allocation5 + $0xc] ss:$16 sps:$4 sm:$0xff]  }
 0xe45   : > { %3659 = vmatprep.mubr.msk.bf16.mxu0 %vm3971_vm2, %v3970_v6 }
 0xf17   : > { %v1937_v14 = vpop.f32.mrb[44].mxu0 }
 0xf18   : > { %v1938_v15 = vadd.f32 %v1937_v14, %v1895_v9  ;;  %v3645_v16 = vpop.f32.mrb[45].mxu0  ;;  %v3306_v14 = vld [vmem:[%s4738_s5 + $0x8] sm:$0x3] }
 0xf19   : > { %v1940_v17 = vpop.f32.mrb[46].mxu0  ;;  %v3797_v16 = vld [vmem:[#allocation5 + $0x2c] ss:$16 sps:$4 sm:$0xff]  }
 0xf1a   : > { %v1943_v18 = vmax.f32 %v1938_v15, 0.0  ;;  %v3646_v21 = vpop.f32.mrb[47].mxu0  ;;  %v3789_v15 = vld [vmem:[#allocation5 + $0x8] ss:$16 sps:$4 sm:$0xff]  }
 0xf1b   : > { %v3801_v17 = vld [vmem:[#allocation5 + $0x48] ss:$16 sps:$4 sm:$0xff]  }
 0xf1c   : > { %1947 = vrot.lane.b32.xlu0 %v1943_v18, %s3968_s14  ;;  %1944 = vrot.lane.b32.xlu1 %v1943_v18, %s3973_s18  ;;  %v3807_v21 = vld [vmem:[#allocation5 + $0x68] ss:$16 sps:$4 sm:$0xff]  }
 0xf20   : > { %2101 = vperm.xlu1 %3751, %v3305_v22   ;;  %v3815_v22 = vld [vmem:[#allocation5 + $0x8c] ss:$16 sps:$4 sm:$0xff]  }
 0xf8e   : > { %v1948_v23 = vpop.permute.xlu0 %1947  ;;  %v1945_v20 = vpop.permute.xlu1 %1944 }
 0xf8f   : > { %v1949_v24 = vmul.f32 %v4227_v37, %v1948_v23  ;;  %v1946_v25 = vmul.f32 %v4223_v34, %v1945_v20  ;;  %v3302_v34 = vld [vmem:[%s4736_s3 + $0x38] sm:$0xf]  ;;  %v3301_v37 = vld [vmem:[%s4736_s3 + $0x34] sm:$0xf]  ;;  %v3821_v20 = vld [vmem:[#allocation5 + $0xac] ss:$16 sps:$4 sm:$0xff]  }
 0xf90   : > { %v3813_v23 = vld [vmem:[#allocation5 + $0x88] ss:$16 sps:$4 sm:$0xff]  }
 0xf91   : > { %v1950_v27 = vpack.c.bf16 %v1943_v18, %v1946_v25  ;;  %v1951_v28 = vpack.c.bf16 %v1949_v24, %v1949_v24  ;;  %v3809_v18 = vld [vmem:[#allocation5 + $0x6c] ss:$16 sps:$4 sm:$0xff]   ;;  %v3819_v24 = vld [vmem:[#allocation5 + $0xa8] ss:$16 sps:$4 sm:$0xff]   ;;  %v3824_v25 = vld [vmem:[#allocation5 + $0xc4] ss:$16 sps:$4 sm:$0xff]  }
 0xf93   : > { %3648 = vmatpush3.bf16.msra.mxu1 %v1950_v27  ;;  %3656 = vmatpush3.bf16.msra.mxu0 %v1950_v27  ;;  %v1958_v29 = vsel %vm854_vm7, %v1951_v28, 0  ;;  %v3822_v28 = vld [vmem:[#allocation5 + $0xc0] ss:$16 sps:$4 sm:$0xff]  }
 0xf94   : > { %3649 = vmatprep.subr.bf16.mxu1 %v3970_v6  ;;  %3657 = vmatprep.subr.bf16.mxu0 %v3970_v6 }
 0xf97   : > { %3650 = vmatpush3.bf16.msra.mxu1 %v1958_v29  ;;  %3658 = vmatpush3.bf16.msra.mxu0 %v1958_v29 }
 0xf98   : > { %3663 = vmatprep.subr.bf16.mxu1 %v3970_v6  ;;  %3671 = vmatprep.subr.bf16.mxu0 %v3970_v6 }
 0xf9a   : > { %3652 = vmatmul.mubr.msk.bf16.vlgmr.msra.gmra.mrb[44].mxu1 %vm850_vm8, %v3299_v31  ;;  %3660 = vmatmul.mubr.msk.bf16.vlgmr.msra.gmra.mrb[48].mxu0 %vm850_vm8, %v3302_v34  ;;  %v3830_v31 = vld [vmem:[#allocation5 + $0xe4] ss:$16 sps:$4 sm:$0xff]   ;;  %v3833_v34 = vld [vmem:[#allocation5 + $0xec] ss:$16 sps:$4 sm:$0xff]  }
 0xf9b   : > { %3664 = vmatpush3.bf16.msra.mxu1 %v1950_v27  ;;  %3667 = vmatprep.mubr.msk.bf16.mxu1 %vm3971_vm2, %v3970_v6  ;;  %v3827_v27 = vld [vmem:[#allocation5 + $0xcc] ss:$16 sps:$4 sm:$0xff]  }
 0xf9c   : > { %3665 = vmatprep.subr.bf16.mxu1 %v3970_v6  ;;  %3673 = vmatprep.mubr.msk.bf16.mxu0 %vm3971_vm2, %v3970_v6 }
 0xf9f   : > { %3666 = vmatpush3.bf16.msra.mxu1 %v1958_v29  ;;  %v2102_v63 = vpop.permute.xlu1 %2101  ;;  %v3825_v29 = vld [vmem:[#allocation5 + $0xc8] ss:$16 sps:$4 sm:$0xff]  }
 0xfa0   : > { %2358 = vmatprep.subr.bf16.mxu1 %v3788_v48 }
 0xfa2   : > { %3668 = vmatmul.mubr.msk.bf16.vlgmr.msra.gmra.mrb[48].mxu1 %vm850_vm8, %v3301_v37  ;;  %v3828_v37 = vld [vmem:[#allocation5 + $0xe0] ss:$16 sps:$4 sm:$0xff]  }
 0xfa3   : > { %2390 = vmatprep.mubr.bf16.mxu1 %v3972_v8  ;;  %2359 = vmatpush1.bf16.msra.mxu1 %v3786_v47 }
 0xfa4   : > { %2360 = vmatprep.subr.bf16.mxu1 %v3794_v51 }
 0xfa7   : > { %2361 = vmatpush1.bf16.msra.mxu1 %v3792_v52 }
 0xfa8   : > { %2362 = vmatprep.subr.bf16.mxu1 %v3800_v53 }
 0xfab   : > { %2363 = vmatpush1.bf16.msra.mxu1 %v3798_v54 }
 0xfac   : > { %2364 = vmatprep.subr.bf16.mxu1 %v3806_v55 }
 0xfaf   : > { %2365 = vmatpush1.bf16.msra.mxu1 %v3804_v56 }
 0xfb0   : > { %2366 = vmatprep.subr.bf16.mxu1 %v3812_v57 }
 0xfb3   : > { %2367 = vmatpush1.bf16.msra.mxu1 %v3810_v58 }
 0xfb4   : > { %2368 = vmatprep.subr.bf16.mxu1 %v3818_v59 }
 0xfb7   : > { %2369 = vmatpush1.bf16.msra.mxu1 %v3816_v60  ;;  %v3353_v60 = vld [vmem:[%s4734_s1 + $0x14] sm:$0xf] }
 0xfb8   : > { %2370 = vmatprep.subr.bf16.mxu1 %v3824_v25  ;;  %v2443_v25 = vand.u32 255, %v4167_v26 }
 0xfbb   : > { %2371 = vmatpush1.bf16.msra.mxu1 %v3822_v28 }
 0xfbc   : > { %2372 = vmatprep.subr.bf16.mxu1 %v3830_v31 }
 0xfbf   : > { %2373 = vmatpush1.bf16.msra.mxu1 %v3828_v37 }
0x106d   : > { %v1994_v32 = vpop.f32.mrb[44].mxu1  ;;  %v2041_v33 = vpop.f32.mrb[48].mxu0 }
0x106e   : > { %2047 = vrot.lane.b32.xlu0 %v1994_v32, %s3974_s17  ;;  %v3653_v35 = vpop.f32.mrb[45].mxu1  ;;  %2093 = vrot.lane.b32.xlu1 %v2041_v33, %s3975_s22  ;;  %v3661_v36 = vpop.f32.mrb[49].mxu0  ;;  %v3831_v32 = vld [vmem:[#allocation5 + $0xe8] ss:$16 sps:$4 sm:$0xff]  }
0x106f   : > { %v1997_v38 = vpop.f32.mrb[46].mxu1  ;;  %v2044_v39 = vpop.f32.mrb[50].mxu0 }
0x1070   : > { %v3654_v42 = vpop.f32.mrb[47].mxu1  ;;  %v3662_v43 = vpop.f32.mrb[51].mxu0 }
0x1072   : > { %1286 = vperm.xlu0 %3750, %v3268_v40   ;;  %2113 = vperm.xlu1 %3751, %v3307_v41  }
0x1075   : > { %v2087_v45 = vpop.f32.mrb[48].mxu1 }
0x1076   : > { %2509 = vperm.xlu0 %3750, %v3354_v44   ;;  %v3669_v46 = vpop.f32.mrb[49].mxu1 }
0x1077   : > { %v2090_v49 = vpop.f32.mrb[50].mxu1 }
0x1078   : > { %v3670_v50 = vpop.f32.mrb[51].mxu1 }
0x10e0   : > { %v2048_v0 = vpop.permute.xlu0 %2047  ;;  %v2094_v1 = vpop.permute.xlu1 %2093 }
0x10e1   : > { %v2049_v2 = vmul.f32 %v4264_v61, %v2048_v0  ;;  %v2095_v3 = vmul.f32 %v4267_v62, %v2094_v1  ;;  %v3795_v61 = vld [vmem:[#allocation5 + $0x28] ss:$16 sps:$4 sm:$0xff]   ;;  %v3803_v62 = vld [vmem:[#allocation5 + $0x4c] ss:$16 sps:$4 sm:$0xff]  }
0x10e3   : > { %v2088_v4 = vadd.f32 %v2087_v45, %v2049_v2 }
0x10e5   : > { %v2096_v5 = vadd.f32 %v2095_v3, %v2088_v4 }
0x10e7   : > { %v2104_v7 = vadd.f32 %v2102_v63, %v2096_v5 }
0x10e9   : > { %v2105_v11 = vmax.f32 %v2104_v7, 0.0 }
0x10eb   : > { %v2108_v12 = vpack.c.bf16 %v2105_v11, %v2105_v11 }
0x10ed   : > { %v2120_v9 = vsel %vm854_vm7, %v2108_v12, 0 }
0x10ee   : > { %3672 = vmatpush3.bf16.msra.mxu0 %v2120_v9 }
0x10ef   : > { %2399 = vmatprep.subr.bf16.mxu0 %v3791_v13 }
0x10f1   : > { %3674 = vmatmul.mubr.msk.bf16.vlgmr.msra.gmra.mrb[52].mxu0 %vm1011_vm11, %v3306_v14  ;;  %v1287_v33 = vpop.permute.xlu0 %1286  ;;  %v2114_v36 = vpop.permute.xlu1 %2113 }
0x10f2   : > { %2400 = vmatpush1.bf16.msra.mxu0 %v3789_v15  ;;  %2431 = vmatprep.mubr.bf16.mxu0 %v3972_v8  ;;  %v1330_v35 = vadd.f32 %v4378_v30, %v1287_v33 }
0x10f3   : > { %2401 = vmatprep.subr.bf16.mxu0 %v3797_v16 }
0x10f4   : > { %v1335_v39 = vadd.f32 %v1330_v35, %v4280_v19 }
0x10f5   : > { %v2510_v63 = vpop.permute.xlu0 %2509 }
0x10f6   : > { %2402 = vmatpush1.bf16.msra.mxu0 %v3795_v61  ;;  %v1336_v45 = vmax.f32 %v1335_v39, 0.0 }
0x10f7   : > { %2403 = vmatprep.subr.bf16.mxu0 %v3803_v62 }
0x10fa   : > { %2404 = vmatpush1.bf16.msra.mxu0 %v3801_v17  ;;  %v3374_v17 = vld [vmem:[%s4737_s4 + $0x28] sm:$0xff] }
0x10fb   : > { %2405 = vmatprep.subr.bf16.mxu0 %v3809_v18  ;;  %v4567_v18 = vadd.s32 128, %v4167_v26 }
0x10fe   : > { %2406 = vmatpush1.bf16.msra.mxu0 %v3807_v21  ;;  %v4570_v21 = vadd.s32 256, %v4167_v26 }
0x10ff   : > { %2407 = vmatprep.subr.bf16.mxu0 %v3815_v22  ;;  %v2444_v22 = vand.u32 255, %v4567_v18 }
0x1101   : > { %vm2488_vm10 = vcmp.lt.s32.totalorder %v2444_v22, 240 }
0x1102   : > { %2408 = vmatpush1.bf16.msra.mxu0 %v3813_v23  ;;  %v4574_v23 = vadd.s32 384, %v4167_v26 }
0x1103   : > { %2409 = vmatprep.subr.bf16.mxu0 %v3821_v20  ;;  %v2445_v20 = vand.u32 255, %v4570_v21 }
0x1105   : > { %v2449_v28 = vand.u32 15, %v2445_v20 }
0x1106   : > { %2410 = vmatpush1.bf16.msra.mxu0 %v3819_v24  ;;  %v2448_v24 = vand.u32 15, %v2444_v22 }
0x1107   : > { %2411 = vmatprep.subr.bf16.mxu0 %v3827_v27  ;;  %v2446_v27 = vand.u32 255, %v4574_v23  ;;  %vm2453_vm14 = vcmp.ge.s32.totalorder %v2449_v28, 1  ;;  %vm2465_vm5 = vcmp.lt.s32.totalorder %v2449_v28, 15 }
0x1108   : > { %vm2452_vm12 = vcmp.ge.s32.totalorder %v2448_v24, 1 }
0x1109   : > { %v2450_v31 = vand.u32 15, %v2446_v27  ;;  %v3342_v37 = vsel %vm2452_vm12, 1.0, %v3970_v6  ;;  %vm2490_vm12 = vcmp.lt.s32.totalorder %v2446_v27, 240 }
0x110a   : > { %2412 = vmatpush1.bf16.msra.mxu0 %v3825_v29  ;;  %v2447_v29 = vand.u32 15, %v2443_v25 }
0x110b   : > { %2413 = vmatprep.subr.bf16.mxu0 %v3833_v34  ;;  %vm2454_vm2 = vcmp.ge.s32.totalorder %v2450_v31, 1  ;;  %vm2466_vm6 = vcmp.lt.s32.totalorder %v2450_v31, 15 }
0x110c   : > { %vm2451_vm15 = vcmp.ge.s32.totalorder %v2447_v29, 1 }
0x110d   : > { %v3341_v39 = vsel %vm2451_vm15, 1.0, %v3970_v6 }
0x110e   : > { %2414 = vmatpush1.bf16.msra.mxu0 %v3831_v32 }
0x11c4   : > { %v2156_v38 = vpop.f32.mrb[52].mxu0 }
0x11c5   : > { %v2157_v40 = vadd.f32 %v2156_v38, %v2114_v36  ;;  %v3675_v41 = vpop.f32.mrb[53].mxu0  ;;  %v3343_v36 = vsel %vm2453_vm14, 1.0, %v3970_v6 }
0x11c6   : > { %v2159_v42 = vpop.f32.mrb[54].mxu0 }
0x11c7   : > { %v2162_v43 = vadd.f32 %v2157_v40, %v4462_v10  ;;  %v3676_v44 = vpop.f32.mrb[55].mxu0  ;;  %v3344_v40 = vsel %vm2454_vm2, 1.0, %v3970_v6 }
0x11c9   : > { %v2163_v46 = vmax.f32 %v2162_v43, 0.0 }
0x11cb   : > { %v2164_v47 = vadd.f32 %v2163_v46, %v1336_v45 }
0x11cd   : > { %v2165_v48 = vpack.c.bf16 %v2164_v47, %v2164_v47 }
0x11cf   : > { %2391 = vmatmul.mubr.bf16.vlgmr.msra.gmra.mrb[52].mxu1 %v2165_v48  ;;  %2432 = vmatmul.mubr.bf16.vlgmr.msra.gmra.mrb[56].mxu0 %v2165_v48 }
0x11d0   : > { %2559 = vmatprep.mubr.bf16.mxu1 %v3972_v8  ;;  %2600 = vmatprep.mubr.bf16.mxu0 %v3972_v8 }
0x12a2   : > { %v4528_v30 = vpop.f32.mrb[52].mxu1  ;;  %v4530_v49 = vpop.f32.mrb[56].mxu0 }
0x12a3   : > { %v2501_v19 = vpack.c.bf16 %v4528_v30, %v4528_v30  ;;  %v2503_v10 = vpack.c.bf16 %v4530_v49, %v4530_v49  ;;  %v4536_v50 = vpop.f32.mrb[53].mxu1  ;;  %v4538_v51 = vpop.f32.mrb[57].mxu0 }
0x12a4   : > { %v2502_v52 = vpack.c.bf16 %v4536_v50, %v4536_v50  ;;  %v2504_v53 = vpack.c.bf16 %v4538_v51, %v4538_v51  ;;  %v2396_v54 = vpop.f32.mrb[54].mxu1  ;;  %v2437_v55 = vpop.f32.mrb[58].mxu0 }
0x12a5   : > { %v2397_v56 = vpop.f32.mrb[55].mxu1  ;;  %v2438_v57 = vpop.f32.mrb[59].mxu0  ;;  %v2516_v58 = vsel %vm796_vm3, %v2501_v19, 0  ;;  %v2522_v59 = vsel %vm796_vm3, %v2503_v10, 0 }
0x12a6   : > { %3355 = vmatprep.subr.msk.bf16.mxu1 %vm796_vm3, %v2502_v52  ;;  %3357 = vmatprep.subr.msk.bf16.mxu0 %vm796_vm3, %v2504_v53  ;;  %vm2463_vm3 = vcmp.lt.s32.totalorder %v2447_v29, 15 }
0x12a7   : > { %2528 = vmatpush1.bf16.msra.mxu1 %v2516_v58  ;;  %2569 = vmatpush1.bf16.msra.mxu0 %v2522_v59  ;;  %v3345_v10 = vsel %vm2463_vm3, 1.0, %v3970_v6 }
0x12aa   : > { %3356 = vmatmul.mubr.msk.bf16.vlgmr.msra.gmra.mrb[56].mxu1 %vm792_vm4, %v3353_v60  ;;  %3358 = vmatmul.mubr.msk.bf16.vlgmr.msra.gmra.mrb[60].mxu0 %vm792_vm4, %v3353_v60  ;;  %vm2464_vm4 = vcmp.lt.s32.totalorder %v2448_v24, 15  ;;  %v3347_v60 = vsel %vm2465_vm5, 1.0, %v3970_v6 }
0x12ab   : > { %2703 = vmatprep.mubr.bf16.mxu1 %v3972_v8  ;;  %2744 = vmatprep.mubr.bf16.mxu0 %v3972_v8  ;;  %v3346_v58 = vsel %vm2464_vm4, 1.0, %v3970_v6 }
0x137d   : > { %v2561_v0 = vpop.f32.mrb[56].mxu1  ;;  %v2602_v1 = vpop.f32.mrb[60].mxu0 }
0x137e   : > { %v2562_v2 = vadd.f32 %v2561_v0, %v2510_v63  ;;  %v2563_v3 = vpop.f32.mrb[57].mxu1  ;;  %v2604_v4 = vpop.f32.mrb[61].mxu0  ;;  %v2603_v13 = vadd.f32 %v2602_v1, %v2510_v63 }
0x137f   : > { %v2564_v5 = vadd.f32 %v2563_v3, %v2510_v63  ;;  %v2565_v7 = vpop.f32.mrb[58].mxu1  ;;  %v2606_v11 = vpop.f32.mrb[62].mxu0  ;;  %v2605_v16 = vadd.f32 %v2604_v4, %v2510_v63  ;;  %v3348_v63 = vsel %vm2466_vm6, 1.0, %v3970_v6 }
0x1380   : > { %v2609_v12 = vmax.f32 %v2562_v2, 0.0  ;;  %v2566_v9 = vpop.f32.mrb[59].mxu1  ;;  %v2607_v14 = vpop.f32.mrb[63].mxu0  ;;  %v2611_v61 = vmax.f32 %v2603_v13, 0.0 }
0x1381   : > { %v2610_v15 = vmax.f32 %v2564_v5, 0.0  ;;  %v2612_v62 = vmax.f32 %v2605_v16, 0.0  ;;  %v3359_v16 = vld [vmem:[%s4736_s3 + $0x3c] sm:$0xf] }
0x1382   : > { %2613 = vrot.lane.b32.xlu1 %v2609_v12, %s3973_s18 }
0x1383   : > { %2615 = vrot.lane.b32.xlu0 %v2610_v15, %s3973_s18 }
0x1386   : > { %2617 = vrot.lane.b32.xlu1 %v2611_v61, %s3973_s18 }
0x1387   : > { %2619 = vrot.lane.b32.xlu0 %v2612_v62, %s3973_s18 }
0x138a   : > { %2630 = vrot.lane.b32.xlu1 %v2609_v12, %s3968_s14 }
0x138b   : > { %2632 = vrot.lane.b32.xlu0 %v2610_v15, %s3968_s14 }
0x138e   : > { %2634 = vrot.lane.b32.xlu1 %v2611_v61, %s3968_s14 }
0x138f   : > { %2636 = vrot.lane.b32.xlu0 %v2612_v62, %s3968_s14  ;;  %s3122_s14 = sshll.u32 %s355_s23, 4  ;;  %s4691_s14 = int_to_ptr.vmem [resolvable:$true] %s3122_s14 }
0x1390   : > { %s3890_s27 = scalar_lea.vmem %s4691_s14, 256 }
0x1391   : > { %p3891_p12 = scmp.ne.s32.totalorder %s4691_s14, %s3890_s27 }
0x1392   : > { %2968 = vperm.xlu1 %3751, %v3374_v17  }
0x1393   : > { %p3892_p2 = pnand %p3891_p12, %p4761_p1 }
0x1395   : > { %p3893_p3 = pneg %p3892_p2 }
0x13f4   : > { %v2614_v34 = vpop.permute.xlu1 %2613 }
0x13f5   : > { %v2616_v32 = vpop.permute.xlu0 %2615 }
0x13f6   : > { %v2624_v33 = vsel %vm2621_vm13, %v2614_v34, %v2616_v32 }
0x13f7   : > { %v2627_v35 = vmul.f32 %v3342_v37, %v2624_v33 }
0x13f8   : > { %v2618_v38 = vpop.permute.xlu1 %2617 }
0x13f9   : > { %v2623_v41 = vsel %vm2621_vm13, %v2616_v32, %v2618_v38  ;;  %v2620_v42 = vpop.permute.xlu0 %2619  ;;  %v2647_v43 = vpack.c.bf16 %v2610_v15, %v2627_v35 }
0x13fa   : > { %v2628_v44 = vmul.f32 %v3343_v36, %v2623_v41  ;;  %v2622_v45 = vsel %vm2621_vm13, %v2618_v38, %v2620_v42  ;;  %v2625_v46 = vsel %vm2621_vm13, %v2620_v42, %v2614_v34  ;;  %v3376_v42 = vld [vmem:[%s4739_s6 + $0x14] sm:$0xf] }
0x13fb   : > { %v2626_v47 = vmul.f32 %v3341_v39, %v2625_v46  ;;  %v2629_v48 = vmul.f32 %v3344_v40, %v2622_v45  ;;  %2671 = vmatprep.subr.bf16.mxu1 %v2647_v43 }
0x13fc   : > { %v2631_v19 = vpop.permute.xlu1 %2630  ;;  %v2648_v55 = vpack.c.bf16 %v2611_v61, %v2628_v44  ;;  %v3365_v61 = vld [vmem:[%s4736_s3 + $0x44] sm:$0xf] }
0x13fd   : > { %v2646_v52 = vpack.c.bf16 %v2609_v12, %v2626_v47  ;;  %v2633_v53 = vpop.permute.xlu0 %2632  ;;  %v2649_v54 = vpack.c.bf16 %v2612_v62, %v2629_v48  ;;  %v3364_v62 = vld [vmem:[%s4736_s3 + $0x40] sm:$0xf] }
0x13fe   : > { %v2640_v56 = vsel %vm380_vm0, %v2631_v19, %v2633_v53 }
0x13ff   : > { %v2642_v57 = vmul.f32 %v3345_v10, %v2640_v56  ;;  %2672 = vmatpush1.bf16.msra.mxu1 %v2646_v52  ;;  %2712 = vmatprep.subr.bf16.mxu0 %v2649_v54 }
0x1400   : > { %2713 = vmatpush1.bf16.msra.mxu0 %v2648_v55  ;;  %v2635_v59 = vpop.permute.xlu1 %2634 }
0x1401   : > { %v2639_v0 = vsel %vm380_vm0, %v2633_v53, %v2635_v59  ;;  %v2637_v1 = vpop.permute.xlu0 %2636  ;;  %v2650_v2 = vpack.c.bf16 %v2642_v57, %v2642_v57 }
0x1402   : > { %v2643_v3 = vmul.f32 %v3346_v58, %v2639_v0  ;;  %v2638_v4 = vsel %vm380_vm0, %v2635_v59, %v2637_v1  ;;  %v2641_v5 = vsel %vm380_vm0, %v2637_v1, %v2631_v19  ;;  %vm2475_vm0 = vcmp.ge.s32.totalorder %v2443_v25, 16 }
0x1403   : > { %v2644_v7 = vmul.f32 %v3347_v60, %v2638_v4  ;;  %v2645_v11 = vmul.f32 %v3348_v63, %v2641_v5  ;;  %v2660_v14 = vsel %vm854_vm7, %v2650_v2, 0  ;;  %v3349_v56 = vsel %vm2475_vm0, 1.0, %v3970_v6 }
0x1404   : > { %v2651_v12 = vpack.c.bf16 %v2643_v3, %v2643_v3  ;;  %v3351_v5 = vsel %vm2488_vm10, 1.0, %v3970_v6 }
0x1405   : > { %v2652_v13 = vpack.c.bf16 %v2644_v7, %v2644_v7  ;;  %v2653_v9 = vpack.c.bf16 %v2645_v11, %v2645_v11  ;;  %v3352_v7 = vsel %vm2490_vm12, 1.0, %v3970_v6 }
0x1406   : > { %3360 = vmatprep.subr.msk.bf16.mxu1 %vm854_vm7, %v2651_v12 }
0x1407   : > { %2674 = vmatpush1.bf16.msra.mxu1 %v2660_v14  ;;  %3362 = vmatprep.subr.msk.bf16.mxu0 %vm854_vm7, %v2653_v9  ;;  %v2666_v15 = vsel %vm854_vm7, %v2652_v13, 0 }
0x1408   : > { %2715 = vmatpush1.bf16.msra.mxu0 %v2666_v15  ;;  %2760 = vmatprep.subr.bf16.mxu1 %v2647_v43 }
0x1409   : > { %2801 = vmatprep.subr.bf16.mxu0 %v2649_v54 }
0x140a   : > { %3361 = vmatmul.mubr.msk.bf16.vlgmr.msra.gmra.mrb[60].mxu1 %vm850_vm8, %v3359_v16 }
0x140b   : > { %3363 = vmatmul.mubr.msk.bf16.vlgmr.msra.gmra.mrb[64].mxu0 %vm850_vm8, %v3359_v16  ;;  %2761 = vmatpush1.bf16.msra.mxu1 %v2646_v52 }
0x140c   : > { %3366 = vmatprep.subr.msk.bf16.mxu1 %vm854_vm7, %v2651_v12  ;;  %2802 = vmatpush1.bf16.msra.mxu0 %v2648_v55 }
0x140d   : > { %3368 = vmatprep.subr.msk.bf16.mxu0 %vm854_vm7, %v2653_v9  ;;  %2792 = vmatprep.mubr.bf16.mxu1 %v3972_v8 }
0x140e   : > { %2833 = vmatprep.mubr.bf16.mxu0 %v3972_v8 }
0x140f   : > { %2763 = vmatpush1.bf16.msra.mxu1 %v2660_v14 }
0x1410   : > { %2804 = vmatpush1.bf16.msra.mxu0 %v2666_v15  ;;  %2862 = vmatprep.subr.bf16.mxu1 %v2647_v43 }
0x1411   : > { %2903 = vmatprep.subr.bf16.mxu0 %v2649_v54 }
0x1412   : > { %3367 = vmatmul.mubr.msk.bf16.vlgmr.msra.gmra.mrb[64].mxu1 %vm850_vm8, %v3365_v61 }
0x1413   : > { %3369 = vmatmul.mubr.msk.bf16.vlgmr.msra.gmra.mrb[68].mxu0 %vm850_vm8, %v3365_v61  ;;  %2863 = vmatpush1.bf16.msra.mxu1 %v2646_v52  ;;  %v2969_v52 = vpop.permute.xlu1 %2968 }
0x1414   : > { %3370 = vmatprep.subr.msk.bf16.mxu1 %vm854_vm7, %v2651_v12  ;;  %2904 = vmatpush1.bf16.msra.mxu0 %v2648_v55 }
0x1415   : > { %3372 = vmatprep.subr.msk.bf16.mxu0 %vm854_vm7, %v2653_v9  ;;  %2894 = vmatprep.mubr.bf16.mxu1 %v3972_v8 }
0x1416   : > { %2935 = vmatprep.mubr.bf16.mxu0 %v3972_v8 }
0x1417   : > { %2865 = vmatpush1.bf16.msra.mxu1 %v2660_v14 }
0x1418   : > { %2906 = vmatpush1.bf16.msra.mxu0 %v2666_v15 }
0x141a   : > { %3371 = vmatmul.mubr.msk.bf16.vlgmr.msra.gmra.mrb[68].mxu1 %vm850_vm8, %v3364_v62 }
0x141b   : > { %3373 = vmatmul.mubr.msk.bf16.vlgmr.msra.gmra.mrb[72].mxu0 %vm850_vm8, %v3364_v62  ;;  %3039 = vmatprep.mubr.bf16.mxu1 %v3972_v8  ;;  %vm2477_vm8 = vcmp.ge.s32.totalorder %v2445_v20, 16 }
0x141c   : > { %3080 = vmatprep.mubr.bf16.mxu0 %v3972_v8  ;;  %v3350_v60 = vsel %vm2477_vm8, 1.0, %v3970_v6 }
0x14dd   : > { %v2705_v17 = vpop.f32.mrb[60].mxu1 }
0x14de   : > { %2842 = vrot.lane.b32.xlu1 %v2705_v17, %s3976_s26  ;;  %v2707_v24 = vpop.f32.mrb[61].mxu1  ;;  %v2746_v28 = vpop.f32.mrb[64].mxu0 }
0x14df   : > { %2844 = vrot.lane.b32.xlu0 %v2707_v24, %s3976_s26  ;;  %v2709_v29 = vpop.f32.mrb[62].mxu1  ;;  %v2748_v31 = vpop.f32.mrb[65].mxu0 }
0x14e0   : > { %v2710_v34 = vpop.f32.mrb[63].mxu1  ;;  %v2750_v37 = vpop.f32.mrb[66].mxu0 }
0x14e1   : > { %v2751_v32 = vpop.f32.mrb[67].mxu0 }
0x14e2   : > { %2846 = vrot.lane.b32.xlu1 %v2746_v28, %s3976_s26 }
0x14e3   : > { %2848 = vrot.lane.b32.xlu0 %v2748_v31, %s3976_s26  ;;  %s3894_s26 = sshll.u32 %s3977_s24, 4  ;;  %s3895_s26 = int_to_ptr.vmem [resolvable:$false] %s3894_s26 }
0x14e4   : > { %s3896_s17 = scalar_lea.vmem %s3895_s26, 512  ;;  %p3897_p4 = scmp.lt.s32.totalorder %s4691_s14, %s3895_s26 }
0x14e5   : > { %v2794_v33 = vpop.f32.mrb[64].mxu1  ;;  %p3898_p7 = scmp.lt.s32.totalorder %s3896_s17, %s3890_s27 }
0x14e6   : > { %v2796_v35 = vpop.f32.mrb[65].mxu1  ;;  %v2835_v36 = vpop.f32.mrb[68].mxu0 }
0x14e7   : > { %v2798_v38 = vpop.f32.mrb[66].mxu1  ;;  %2946 = vrot.lane.b32.xlu1 %v2796_v35, %s3969_s16  ;;  %2944 = vrot.lane.b32.xlu0 %v2794_v33, %s3969_s16  ;;  %v2837_v8 = vpop.f32.mrb[69].mxu0  ;;  %p3899_p8 = por %p3898_p7, %p3897_p4 }
0x14e8   : > { %v2799_v39 = vpop.f32.mrb[67].mxu1  ;;  %v2839_v40 = vpop.f32.mrb[70].mxu0 }
0x14e9   : > { %v2840_v41 = vpop.f32.mrb[71].mxu0  ;;  %p3900_p11 = pnand %p3899_p8, %p3893_p3 }
0x14eb   : > { %2948 = vrot.lane.b32.xlu0 %v2835_v36, %s3969_s16  ;;  %2950 = vrot.lane.b32.xlu1 %v2837_v8, %s3969_s16  ;;  %v3375_v8 = vld [vmem:[%s4738_s5 + $0xa] sm:$0x3] }
0x14ed   : > { %v2896_v43 = vpop.f32.mrb[68].mxu1 }
0x14ee   : > { %v2898_v44 = vpop.f32.mrb[69].mxu1  ;;  %v2937_v45 = vpop.f32.mrb[72].mxu0 }
0x14ef   : > { %2989 = vperm.xlu0 %3750, %v3376_v42   ;;  %v2939_v46 = vpop.f32.mrb[73].mxu0  ;;  %v2900_v47 = vpop.f32.mrb[70].mxu1 }
0x14f0   : > { %v2941_v48 = vpop.f32.mrb[74].mxu0  ;;  %v2901_v19 = vpop.f32.mrb[71].mxu1 }
0x14f1   : > { %v2942_v10 = vpop.f32.mrb[75].mxu0 }
0x1550   : > { %v2843_v53 = vpop.permute.xlu1 %2842 }
0x1551   : > { %v2845_v54 = vpop.permute.xlu0 %2844 }
0x1552   : > { %v2853_v20 = vsel %vm2850_vm9, %v2843_v53, %v2845_v54 }
0x1553   : > { %v2899_v14 = vadd.f32 %v2898_v44, %v2853_v20 }
0x1554   : > { %v2847_v55 = vpop.permute.xlu1 %2846 }
0x1555   : > { %v2849_v57 = vpop.permute.xlu0 %2848  ;;  %v2852_v58 = vsel %vm2850_vm9, %v2845_v54, %v2847_v55 }
0x1556   : > { %v2854_v59 = vsel %vm2850_vm9, %v2849_v57, %v2843_v53  ;;  %v2857_v0 = vmul.f32 %v3350_v60, %v2852_v58  ;;  %v2851_v4 = vsel %vm2850_vm9, %v2847_v55, %v2849_v57 }
0x1557   : > { %v2855_v63 = vmul.f32 %v3349_v56, %v2854_v59  ;;  %v2940_v27 = vadd.f32 %v2939_v46, %v2851_v4 }
0x1558   : > { %v2938_v11 = vadd.f32 %v2937_v45, %v2857_v0 }
0x1559   : > { %v2945_v1 = vpop.permute.xlu0 %2944  ;;  %v2897_v2 = vadd.f32 %v2896_v43, %v2855_v63  ;;  %v2947_v3 = vpop.permute.xlu1 %2946 }
0x155a   : > { %v2954_v21 = vsel %vm409_vm1, %v2945_v1, %v2947_v3 }
0x155b   : > { %v2960_v25 = vadd.f32 %v2954_v21, %v2897_v2 }
0x155d   : > { %v2971_v12 = vadd.f32 %v2969_v52, %v2960_v25  ;;  %v2949_v13 = vpop.permute.xlu0 %2948  ;;  %v2951_v9 = vpop.permute.xlu1 %2950 }
0x155e   : > { %v2953_v18 = vsel %vm409_vm1, %v2947_v3, %v2949_v13  ;;  %v2952_v22 = vsel %vm409_vm1, %v2949_v13, %v2951_v9  ;;  %v2955_v23 = vsel %vm409_vm1, %v2951_v9, %v2945_v1 }
0x155f   : > { %v2957_v15 = vmul.f32 %v3351_v5, %v2953_v18  ;;  %v2959_v16 = vmul.f32 %v3352_v7, %v2955_v23  ;;  %v2962_v61 = vadd.f32 %v2952_v22, %v2938_v11  ;;  %v2975_v62 = vmax.f32 %v2971_v12, 0.0 }
0x1561   : > { %v2961_v6 = vadd.f32 %v2957_v15, %v2899_v14  ;;  %v2963_v17 = vadd.f32 %v2959_v16, %v2940_v27  ;;  %v2973_v24 = vadd.f32 %v2969_v52, %v2962_v61  ;;  %v2981_v32 = vpack.c.bf16 %v2975_v62, %v2975_v62 }
0x1563   : > { %v2972_v28 = vadd.f32 %v2969_v52, %v2961_v6  ;;  %v2974_v29 = vadd.f32 %v2969_v52, %v2963_v17  ;;  %v2977_v31 = vmax.f32 %v2973_v24, 0.0  ;;  %v2996_v36 = vsel %vm854_vm7, %v2981_v32, 0 }
0x1565   : > { %v2976_v34 = vmax.f32 %v2972_v28, 0.0  ;;  %v2978_v37 = vmax.f32 %v2974_v29, 0.0  ;;  %v2983_v33 = vpack.c.bf16 %v2977_v31, %v2977_v31 }
0x1567   : > { %v2982_v35 = vpack.c.bf16 %v2976_v34, %v2976_v34  ;;  %v2984_v26 = vpack.c.bf16 %v2978_v37, %v2978_v37  ;;  %v3002_v38 = vsel %vm854_vm7, %v2983_v33, 0 }
0x1569   : > { %3377 = vmatprep.subr.msk.bf16.mxu1 %vm854_vm7, %v2982_v35  ;;  %3379 = vmatprep.subr.msk.bf16.mxu0 %vm854_vm7, %v2984_v26 }
0x156a   : > { %3008 = vmatpush1.bf16.msra.mxu1 %v2996_v36  ;;  %3049 = vmatpush1.bf16.msra.mxu0 %v3002_v38 }
0x156d   : > { %3378 = vmatmul.mubr.msk.bf16.vlgmr.msra.gmra.mrb[72].mxu1 %vm1011_vm11, %v3375_v8  ;;  %3380 = vmatmul.mubr.msk.bf16.vlgmr.msra.gmra.mrb[76].mxu0 %vm1011_vm11, %v3375_v8 }
0x156e   : > { %v2990_v39 = vpop.permute.xlu0 %2989 }
0x1640   : > { %v3041_v40 = vpop.f32.mrb[72].mxu1  ;;  %v3082_v41 = vpop.f32.mrb[76].mxu0 }
0x1641   : > { %v3042_v42 = vadd.f32 %v3041_v40, %v2990_v39  ;;  %v3083_v43 = vadd.f32 %v3082_v41, %v2990_v39  ;;  %v3043_v44 = vpop.f32.mrb[73].mxu1  ;;  %v3084_v45 = vpop.f32.mrb[77].mxu0 }
0x1642   : > { %v3044_v46 = vadd.f32 %v3043_v44, %v2990_v39  ;;  %v3085_v47 = vadd.f32 %v3084_v45, %v2990_v39  ;;  %v3045_v48 = vpop.f32.mrb[74].mxu1  ;;  %v3086_v19 = vpop.f32.mrb[78].mxu0 }
0x1643   : > { %v3089_v10 = vadd.f32 %v3042_v42, %v4528_v30  ;;  %v3091_v52 = vadd.f32 %v3083_v43, %v4530_v49  ;;  %v3046_v53 = vpop.f32.mrb[75].mxu1  ;;  %v3087_v54 = vpop.f32.mrb[79].mxu0 }
0x1644   : > { %v3090_v55 = vadd.f32 %v3044_v46, %v4536_v50  ;;  %v3092_v56 = vadd.f32 %v3085_v47, %v4538_v51 }
0x1645   : > { %v3093_v57 = vmax.f32 %v3089_v10, 0.0  ;;  %v3095_v58 = vmax.f32 %v3091_v52, 0.0 }
0x1646   : > { %v3094_v59 = vmax.f32 %v3090_v55, 0.0  ;;  %v3096_v60 = vmax.f32 %v3092_v56, 0.0 }
0x1648   : > { %v3101_v63 = vcombine.low %v3093_v57, %v3094_v59  ;;  %v3102_v0 = vcombine.low %v3095_v58, %v3096_v60 }
0x164a   : > { %3105 = vst [vmem:[%s355_s23] sm:$0xff] %v3101_v63  ;;  %3106 = vst [vmem:[%s355_s23 + $0x8] sm:$0xff] %v3102_v0 }
0x164b   : > { %3903 = shalt.err (!%p3900_p11)
}
0x164c   : > { %s3904_s22 = scalar_lea.hbm %s4689_s15, 256  ;;  %s3908_s21 = scalar_lea.hbm %s4742_s9, 512 }
0x164d   : > { %p3905_p13 = scmp.ne.s32.totalorder %s4689_s15, %s3904_s22  ;;  %p3909_p6 = scmp.lt.u32.totalorder %s4689_s15, %s4742_s9 }
0x164e   : > { %p3910_p9 = scmp.lt.u32.totalorder %s3908_s21, %s3904_s22  ;;  %p3912_p12 = scmp.lt.u32.totalorder %s3904_s22, %s4689_s15 }
0x164f   : > { %p3906_p0 = pnand %p3905_p13, %p4761_p1 }
0x1650   : > { %p3911_p10 = por %p3910_p9, %p3909_p6 }
0x1651   : > { %p3907_p5 = pneg %p3906_p0 }
0x1652   : > { %p3913_p2 = por %p3912_p12, %p3911_p10 }
0x1654   : > { %p3914_p3 = pnand %p3913_p2, %p3907_p5 }
0x1656   : > { %3917 = shalt.err (!%p3914_p3)
}
0x1657   : > { %3685 = dma.vmem_to_hbm [thread:$0]  (%p4761_p1), %s4691_s14, 256, %s4689_s15, %s3108_s13  }
0x1658 PF: > { %p3702_p4 = scmp.ge.s32.totalorder %s3960_s12, 2  ;;  %s3134_s23 = sand.u32 1, %s3948_s30  }
0x1659   : > { %p4762_p7 = scmp.ne.s32.totalorder %s4753_s20, 0  ;;  %s3135_s18 = scalar_lea.sflag [#allocation4], %s3134_s23 }
0x165b   : > { %p3695_p8 = pnand %p3702_p4, %p4762_p7 }
0x165d   : > { %3943 = dma.done.wait (!%p3695_p8), %s3135_s18, 256  }
0x165e   : > { %3945 = vsyncadd (!%p3695_p8), %s3135_s18, 4294967040  ;;  %s4763_s12 = sld [smem:[#allocation12_spill]]  ;;  %s4764_s11 = sld [smem:[#allocation11_spill]] }
0x165f   : > { %s4765_s27 = sld [smem:[#allocation13_spill]]  ;;  %s4766_s30 = smov %s3952_s10 }
0x1664   : > { %p21_p11 = scmp.ge.s32.totalorder %s4763_s12, 4   ;;  %s4767_s10 = smov %s4764_s11 }
0x1665   : > { %s4768_s11 = smov %s4765_s27 }
0x1666   :  { %23 = sbr.rel (!%p21_p11) target bundleno = 5 (0x5), region = 142 }
0x166d   :  { %3140 = vsyncpa [#allocation3], 1 }
0x166e   :  { %3142 = vsyncpa [#allocation3 + $0x1], 1 }
0x166f   :  { %3143 = vsyncpa [#allocation6], 1 }
0x1670   :  { %3144 = vsyncpa [#allocation4], 1 }
0x1671   :  { %3146 = vsyncpa [#allocation4 + $0x1], 1 }

</bundles_post_ra>
